<compile_context>
chip_gen: v7x
topology: tpu7x:2x2x1
jax: 0.10.0
libtpu: 0.0.40
codegen_flags: <defaults>
</compile_context>

<pallas_src>
import functools

import jax
import jax.numpy as jnp
from jax.experimental import pallas as pl
from jax.experimental.pallas import tpu as pltpu


def _cross_modal_attention_kernel(
    q_ref, k_ref, v_ref,
    wqp_ref,                    # query_proj weight (residual branch): (Dq, E)
    wqf_ref,                    # query_proj fused with MHA q in-proj, scale folded: (Dq, E)
    wkf_ref,                    # key_proj fused with MHA k in-proj: (Dk, E)
    wvf_ref,                    # value_proj fused with MHA v in-proj: (Dk, E)
    wo_ref,                     # MHA out-proj: (E, E)
    vec_ref,                    # packed (8, E): [b_qproj, bq_f, bk_f, bv_f, b_out, gamma, beta, 0]
    out_ref,
    ctx_ref,                    # VMEM scratch (tB, Tq, E) f32: concatenated head contexts
    *, num_heads, eps):
    tB, Tq, Dq = q_ref.shape
    _, Tk, Dk = k_ref.shape
    E = wqp_ref.shape[1]
    H = num_heads
    Dh = E // H
    cdt = wqp_ref.dtype         # MXU-input dtype (f32 or bf16); accumulation is f32
    f32 = jnp.float32

    # Activations already arrive in the compute dtype (cast in the wrapper).
    q = q_ref[...].reshape(tB * Tq, Dq)
    k = k_ref[...].reshape(tB * Tk, Dk)
    v = v_ref[...].reshape(tB * Tk, Dk)

    vec = vec_ref[...].astype(f32)
    b_qproj, bq_f, bk_f, bv_f = vec[0:1], vec[1:2], vec[2:3], vec[3:4]
    b_out, gamma, beta = vec[4:5], vec[5:6], vec[6:7]

    # Four INDEPENDENT projections on the flattened (tB*T, D) slabs (the q in-proj no
    # longer waits on q_proj thanks to the host-side fusion).
    q_proj = jnp.dot(q, wqp_ref[...], preferred_element_type=f32) + b_qproj   # residual
    qp = jnp.dot(q, wqf_ref[...], preferred_element_type=f32) + bq_f          # pre-scaled
    kp = jnp.dot(k, wkf_ref[...], preferred_element_type=f32) + bk_f
    vp = jnp.dot(v, wvf_ref[...], preferred_element_type=f32) + bv_f

    qp3 = qp.reshape(tB, Tq, E)
    kp3 = kp.reshape(tB, Tk, E)
    vp3 = vp.reshape(tB, Tk, E)

    # Per-head attention, batched over the sample axis. Head contexts go straight into
    # the VMEM scratch at static lane offsets (no concatenate chain).
    # TODO(synk): for long Tq/Tk restructure as a flash-style online softmax with a Tk
    # grid axis ("arbitrary", m/l/acc scratch) instead of materializing (Tq, Tk) scores.
    for h in range(H):
        sl = slice(h * Dh, (h + 1) * Dh)
        qh = qp3[:, :, sl]                                           # (tB, Tq, Dh) f32
        kh = kp3[:, :, sl]
        vh = vp3[:, :, sl]
        s = jnp.einsum('bqd,bkd->bqk', qh, kh,
                       preferred_element_type=f32)                   # (tB, Tq, Tk)
        s = s - jnp.max(s, axis=-1, keepdims=True)
        p = jnp.exp(s)
        p = p * pl.reciprocal(jnp.sum(p, axis=-1, keepdims=True), approx=True)
        ctx_ref[:, :, sl] = jnp.einsum('bqk,bkd->bqd', p, vh,
                                       preferred_element_type=f32)   # (tB, Tq, Dh)

    ctx = ctx_ref[...].reshape(tB * Tq, E)
    attn = (jnp.dot(ctx.astype(cdt), wo_ref[...], preferred_element_type=f32)
            + b_out)

    # Residual + LayerNorm epilogue, all in f32.
    # TODO(synk): dropout (inside MHA and on the residual branch) is inference-mode
    # identity; stochastic training dropout is not modeled here.
    resid = q_proj + attn
    mean = jnp.mean(resid, axis=-1, keepdims=True)
    cent = resid - mean
    var = jnp.mean(cent * cent, axis=-1, keepdims=True)
    y = cent * jax.lax.rsqrt(var + eps) * gamma + beta
    out_ref[...] = y.reshape(tB, Tq, E).astype(out_ref.dtype)


def cross_modal_attention_block(query, key, value, prepared, *, num_heads,
                                tile_b=None, eps=1e-5, out_dtype=jnp.float32,
                                core_parallel=False, vmem_limit_bytes=None):
    """query: (B, Tq, D_q); key/value: (B, Tk, D_k). Returns (B, Tq, E) in out_dtype."""
    B, Tq, Dq = query.shape
    _, Tk, Dk = key.shape
    E = prepared["w_qproj"].shape[1]
    H = num_heads
    assert E % H == 0
    if tile_b is None:
        tile_b = B          # grid=1 default: single-TC chips only pay overhead for splits
    assert B % tile_b == 0, "batch must be divisible by tile_b"
    n_tiles = B // tile_b

    cdt = prepared["w_qproj"].dtype
    # Cast activations in the wrapper: this (not an in-kernel astype) is what actually
    # halves q/k/v HBM bytes when the compute dtype is bf16.
    query = query.astype(cdt)
    key = key.astype(cdt)
    value = value.astype(cdt)

    kernel = functools.partial(_cross_modal_attention_kernel, num_heads=H, eps=eps)

    def batch_spec(t, d):
        return pl.BlockSpec((tile_b, t, d), lambda i: (i, 0, 0))

    def full_spec(shape):
        nd = len(shape)
        return pl.BlockSpec(shape, lambda i, _nd=nd: (0,) * _nd)

    weights = (prepared["w_qproj"], prepared["wq_fused"], prepared["wk_fused"],
               prepared["wv_fused"], prepared["w_out"], prepared["vec"])
    in_specs = ([batch_spec(Tq, Dq), batch_spec(Tk, Dk), batch_spec(Tk, Dk)]
                + [full_spec(w.shape) for w in weights])

    if n_tiles == 1:
        semantics = ("arbitrary",)
    elif core_parallel:
        semantics = (pltpu.CORE_PARALLEL,)   # v7x: shard the batch grid across both TCs
    else:
        semantics = ("parallel",)

    # NOTE: current VMEM footprint is well under 1 MiB; when scaling tile_b / sequence
    # lengths, budget double-buffered tiles + weights against v7x's 64 MiB VMEM and set
    # vmem_limit_bytes explicitly.
    return pl.pallas_call(
        kernel,
        out_shape=jax.ShapeDtypeStruct((B, Tq, E), out_dtype),
        grid=(n_tiles,),
        in_specs=in_specs,
        out_specs=pl.BlockSpec((tile_b, Tq, E), lambda i: (i, 0, 0)),
        scratch_shapes=[pltpu.VMEM((tile_b, Tq, E), jnp.float32)],
        compiler_params=pltpu.CompilerParams(
            dimension_semantics=semantics,
            vmem_limit_bytes=vmem_limit_bytes),
    )(query, key, value, *weights)


def make_params(rng, query_dim, key_value_dim, embed_dim):
    """Raw (unfused) parameters, torch-equivalent, stored as (in, out) / (1, out)."""
    E, Dq, Dk = embed_dim, query_dim, key_value_dim
    ks = jax.random.split(rng, 14)
    s = 0.05
    n = lambda k, shape: s * jax.random.normal(k, shape, jnp.float32)
    return {
        "w_qproj": n(ks[0], (Dq, E)), "b_qproj": n(ks[1], (1, E)),
        "w_kproj": n(ks[2], (Dk, E)), "b_kproj": n(ks[3], (1, E)),
        "w_vproj": n(ks[4], (Dk, E)), "b_vproj": n(ks[5], (1, E)),
        "w_qin":   n(ks[6], (E, E)),  "b_qin":   n(ks[7], (1, E)),
        "w_kin":   n(ks[8], (E, E)),  "b_kin":   n(ks[9], (1, E)),
        "w_vin":   n(ks[10], (E, E)), "b_vin":   n(ks[11], (1, E)),
        "w_out":   n(ks[12], (E, E)), "b_out":   n(ks[13], (1, E)),
        "gamma": jnp.ones((1, E), jnp.float32),    # nn.LayerNorm default init
        "beta":  jnp.zeros((1, E), jnp.float32),
    }


def prepare_params(p, *, num_heads, weight_dtype=jnp.bfloat16):
    """Host-side fusion:
       * q path: wq_fused = w_qproj @ w_qin, bq_fused = b_qproj @ w_qin + b_qin, with
         1/sqrt(Dh) folded in (w_qproj kept separately for the residual branch).
       * k/v paths: modality projections folded into the MHA in-projections.
       * all seven (1, E) vectors packed into a single (8, E) operand (f32).
    Matmul weights are cast to `weight_dtype` (bf16 default)."""
    E = p["w_qproj"].shape[1]
    scale = 1.0 / float(E // num_heads) ** 0.5
    wq_fused = (p["w_qproj"] @ p["w_qin"]) * scale
    bq_fused = (p["b_qproj"] @ p["w_qin"] + p["b_qin"]) * scale
    wk_fused = p["w_kproj"] @ p["w_kin"]
    bk_fused = p["b_kproj"] @ p["w_kin"] + p["b_kin"]
    wv_fused = p["w_vproj"] @ p["w_vin"]
    bv_fused = p["b_vproj"] @ p["w_vin"] + p["b_vin"]
    vec = jnp.concatenate(
        [p["b_qproj"], bq_fused, bk_fused, bv_fused,
         p["b_out"], p["gamma"], p["beta"], jnp.zeros((1, E), jnp.float32)],
        axis=0)                                              # (8, E), one VMEM tile
    cast = lambda x: x.astype(weight_dtype)
    return {
        "w_qproj": cast(p["w_qproj"]),
        "wq_fused": cast(wq_fused),
        "wk_fused": cast(wk_fused),
        "wv_fused": cast(wv_fused),
        "w_out":   cast(p["w_out"]),
        "vec":     vec.astype(jnp.float32),
    }


def _reference(query, key, value, p, *, num_heads, eps=1e-5):
    """Pure-JAX mirror of the torch forward (eval mode), using the UNFUSED weights."""
    B, Tq, _ = query.shape
    _, Tk, _ = key.shape
    E = p["w_qproj"].shape[1]
    H = num_heads
    Dh = E // H
    q_proj = query @ p["w_qproj"] + p["b_qproj"]         # (B, Tq, E)
    k_proj = key @ p["w_kproj"] + p["b_kproj"]
    v_proj = value @ p["w_vproj"] + p["b_vproj"]
    qp = q_proj @ p["w_qin"] + p["b_qin"]
    kp = k_proj @ p["w_kin"] + p["b_kin"]
    vp = v_proj @ p["w_vin"] + p["b_vin"]
    qh = qp.reshape(B, Tq, H, Dh)
    kh = kp.reshape(B, Tk, H, Dh)
    vh = vp.reshape(B, Tk, H, Dh)
    scores = jnp.einsum("bqhd,bkhd->bhqk", qh, kh) / (Dh ** 0.5)
    probs = jax.nn.softmax(scores, axis=-1)
    ctx = jnp.einsum("bhqk,bkhd->bqhd", probs, vh).reshape(B, Tq, E)
    attn = ctx @ p["w_out"] + p["b_out"]
    resid = q_proj + attn                                # dropout = identity at eval
    mean = resid.mean(-1, keepdims=True)
    var = ((resid - mean) ** 2).mean(-1, keepdims=True)
    return (resid - mean) / jnp.sqrt(var + eps) * p["gamma"] + p["beta"]


if __name__ == "__main__":
    QUERY_DIM = 64       # e.g. video feature dim
    KV_DIM = 48          # e.g. audio/text feature dim (NOT padded to 128 on purpose)
    EMBED_DIM = 128      # shared attention dim (lane-dense: multiple of 128)
    NUM_HEADS = 4
    BATCH = 4
    T_Q = 8
    T_K = 8

    root = jax.random.PRNGKey(0)
    kq, kk, kv, kp = jax.random.split(root, 4)
    query = jax.random.normal(kq, (BATCH, T_Q, QUERY_DIM), jnp.float32)
    key = jax.random.normal(kk, (BATCH, T_K, KV_DIM), jnp.float32)
    value = jax.random.normal(kv, (BATCH, T_K, KV_DIM), jnp.float32)
    params = make_params(kp, QUERY_DIM, KV_DIM, EMBED_DIM)

    ref = _reference(query, key, value, params, num_heads=NUM_HEADS)

    # f32 weights, grid=1 (default). Tolerance covers the approximate EUP reciprocal in
    # the softmax denominator; everything else on this path is exact f32.
    prep_f32 = prepare_params(params, num_heads=NUM_HEADS, weight_dtype=jnp.float32)
    out_f32 = jax.block_until_ready(
        cross_modal_attention_block(query, key, value, prep_f32, num_heads=NUM_HEADS))
    assert out_f32.shape == (BATCH, T_Q, EMBED_DIM), out_f32.shape
    err_f32 = float(jnp.abs(out_f32 - ref).max())
    assert err_f32 < 5e-3, err_f32

    # f32 weights with a batch-tiled grid (exercises the multi-step pipelined path that
    # core_parallel would shard on a dual-TC v7x).
    out_tiled = jax.block_until_ready(
        cross_modal_attention_block(query, key, value, prep_f32,
                                    num_heads=NUM_HEADS, tile_b=2))
    err_tiled = float(jnp.abs(out_tiled - ref).max())
    assert err_tiled < 5e-3, err_tiled

    # Default path: bf16 weights AND bf16 activations (wrapper cast), f32 accumulate +
    # f32 LayerNorm. Error budget includes activation/intermediate bf16 rounding, hence
    # the loose tolerance.
    prep_bf16 = prepare_params(params, num_heads=NUM_HEADS)   # bf16 default
    out_bf16 = jax.block_until_ready(
        cross_modal_attention_block(query, key, value, prep_bf16, num_heads=NUM_HEADS))
    err_bf16 = float(jnp.abs(out_bf16 - ref).max())
    assert err_bf16 < 1e-1, err_bf16

    print("KERNEL_OK")
</pallas_src>

<mosaic_0001>
module attributes {stable_mosaic.version = 11 : i64} {
  func.func @_cross_modal_attention_kernel(%arg0: i32, %arg1: memref<4x8x64xf32, #tpu.memory_space<vmem>>, %arg2: memref<4x8x48xf32, #tpu.memory_space<vmem>>, %arg3: memref<4x8x48xf32, #tpu.memory_space<vmem>>, %arg4: memref<64x128xf32, #tpu.memory_space<vmem>>, %arg5: memref<64x128xf32, #tpu.memory_space<vmem>>, %arg6: memref<48x128xf32, #tpu.memory_space<vmem>>, %arg7: memref<48x128xf32, #tpu.memory_space<vmem>>, %arg8: memref<128x128xf32, #tpu.memory_space<vmem>>, %arg9: memref<8x128xf32, #tpu.memory_space<vmem>>, %arg10: memref<4x8x128xf32, #tpu.memory_space<vmem>>, %arg11: memref<4x8x128xf32, #tpu.memory_space<vmem>>) attributes {dimension_semantics = [#tpu.dimension_semantics<arbitrary>], iteration_bounds = array<i64: 1>, scalar_prefetch = 0 : i64, scratch_operands = 1 : i64, tpu.core_type = #tpu.core_type<tc>, window_params = [{transform_indices = @transform_0, window_bounds = array<i64: 4, 8, 64>}, {transform_indices = @transform_1, window_bounds = array<i64: 4, 8, 48>}, {transform_indices = @transform_2, window_bounds = array<i64: 4, 8, 48>}, {pipeline_mode = #tpu.pipeline_mode<synchronous>, transform_indices = @transform_3, window_bounds = array<i64: 64, 128>}, {pipeline_mode = #tpu.pipeline_mode<synchronous>, transform_indices = @transform_4, window_bounds = array<i64: 64, 128>}, {pipeline_mode = #tpu.pipeline_mode<synchronous>, transform_indices = @transform_5, window_bounds = array<i64: 48, 128>}, {pipeline_mode = #tpu.pipeline_mode<synchronous>, transform_indices = @transform_6, window_bounds = array<i64: 48, 128>}, {pipeline_mode = #tpu.pipeline_mode<synchronous>, transform_indices = @transform_7, window_bounds = array<i64: 128, 128>}, {pipeline_mode = #tpu.pipeline_mode<synchronous>, transform_indices = @transform_8, window_bounds = array<i64: 8, 128>}, {transform_indices = @transform_9, window_bounds = array<i64: 4, 8, 128>}]} {
    %c0 = arith.constant 0 : index
    %c0_0 = arith.constant 0 : index
    %c0_1 = arith.constant 0 : index
    %0 = vector.load %arg1[%c0, %c0_0, %c0_1] : memref<4x8x64xf32, #tpu.memory_space<vmem>>, vector<4x8x64xf32>
    %1 = vector.shape_cast %0 : vector<4x8x64xf32> to vector<32x64xf32>
    %c0_2 = arith.constant 0 : index
    %c0_3 = arith.constant 0 : index
    %c0_4 = arith.constant 0 : index
    %2 = vector.load %arg2[%c0_2, %c0_3, %c0_4] : memref<4x8x48xf32, #tpu.memory_space<vmem>>, vector<4x8x48xf32>
    %3 = vector.shape_cast %2 : vector<4x8x48xf32> to vector<32x48xf32>
    %c0_5 = arith.constant 0 : index
    %c0_6 = arith.constant 0 : index
    %c0_7 = arith.constant 0 : index
    %4 = vector.load %arg3[%c0_5, %c0_6, %c0_7] : memref<4x8x48xf32, #tpu.memory_space<vmem>>, vector<4x8x48xf32>
    %5 = vector.shape_cast %4 : vector<4x8x48xf32> to vector<32x48xf32>
    %c0_8 = arith.constant 0 : index
    %c0_9 = arith.constant 0 : index
    %6 = vector.load %arg9[%c0_8, %c0_9] : memref<8x128xf32, #tpu.memory_space<vmem>>, vector<8x128xf32>
    %7 = vector.extract_strided_slice %6 {offsets = [0, 0], sizes = [1, 128], strides = [1, 1]} : vector<8x128xf32> to vector<1x128xf32>
    %8 = vector.extract_strided_slice %6 {offsets = [1, 0], sizes = [1, 128], strides = [1, 1]} : vector<8x128xf32> to vector<1x128xf32>
    %9 = vector.extract_strided_slice %6 {offsets = [2, 0], sizes = [1, 128], strides = [1, 1]} : vector<8x128xf32> to vector<1x128xf32>
    %10 = vector.extract_strided_slice %6 {offsets = [3, 0], sizes = [1, 128], strides = [1, 1]} : vector<8x128xf32> to vector<1x128xf32>
    %11 = vector.extract_strided_slice %6 {offsets = [4, 0], sizes = [1, 128], strides = [1, 1]} : vector<8x128xf32> to vector<1x128xf32>
    %12 = vector.extract_strided_slice %6 {offsets = [5, 0], sizes = [1, 128], strides = [1, 1]} : vector<8x128xf32> to vector<1x128xf32>
    %13 = vector.extract_strided_slice %6 {offsets = [6, 0], sizes = [1, 128], strides = [1, 1]} : vector<8x128xf32> to vector<1x128xf32>
    %c0_10 = arith.constant 0 : index
    %c0_11 = arith.constant 0 : index
    %14 = vector.load %arg4[%c0_10, %c0_11] : memref<64x128xf32, #tpu.memory_space<vmem>>, vector<64x128xf32>
    %cst = arith.constant dense<0.000000e+00> : vector<32x128xf32>
    %15 = tpu.matmul %1, %14, %cst {dimension_numbers = #tpu.dot_dimension_numbers<[1], [0], [0], [1], [0, 0, 1, 1], [], []>} : vector<32x64xf32>, vector<64x128xf32>, vector<32x128xf32> -> vector<32x128xf32>
    %16 = vector.broadcast %7 : vector<1x128xf32> to vector<32x128xf32>
    %17 = arith.addf %15, %16 : vector<32x128xf32>
    %c0_12 = arith.constant 0 : index
    %c0_13 = arith.constant 0 : index
    %18 = vector.load %arg5[%c0_12, %c0_13] : memref<64x128xf32, #tpu.memory_space<vmem>>, vector<64x128xf32>
    %cst_14 = arith.constant dense<0.000000e+00> : vector<32x128xf32>
    %19 = tpu.matmul %1, %18, %cst_14 {dimension_numbers = #tpu.dot_dimension_numbers<[1], [0], [0], [1], [0, 0, 1, 1], [], []>} : vector<32x64xf32>, vector<64x128xf32>, vector<32x128xf32> -> vector<32x128xf32>
    %20 = vector.broadcast %8 : vector<1x128xf32> to vector<32x128xf32>
    %21 = arith.addf %19, %20 : vector<32x128xf32>
    %c0_15 = arith.constant 0 : index
    %c0_16 = arith.constant 0 : index
    %22 = vector.load %arg6[%c0_15, %c0_16] : memref<48x128xf32, #tpu.memory_space<vmem>>, vector<48x128xf32>
    %cst_17 = arith.constant dense<0.000000e+00> : vector<32x128xf32>
    %23 = tpu.matmul %3, %22, %cst_17 {dimension_numbers = #tpu.dot_dimension_numbers<[1], [0], [0], [1], [0, 0, 1, 1], [], []>} : vector<32x48xf32>, vector<48x128xf32>, vector<32x128xf32> -> vector<32x128xf32>
    %24 = vector.broadcast %9 : vector<1x128xf32> to vector<32x128xf32>
    %25 = arith.addf %23, %24 : vector<32x128xf32>
    %c0_18 = arith.constant 0 : index
    %c0_19 = arith.constant 0 : index
    %26 = vector.load %arg7[%c0_18, %c0_19] : memref<48x128xf32, #tpu.memory_space<vmem>>, vector<48x128xf32>
    %cst_20 = arith.constant dense<0.000000e+00> : vector<32x128xf32>
    %27 = tpu.matmul %5, %26, %cst_20 {dimension_numbers = #tpu.dot_dimension_numbers<[1], [0], [0], [1], [0, 0, 1, 1], [], []>} : vector<32x48xf32>, vector<48x128xf32>, vector<32x128xf32> -> vector<32x128xf32>
    %28 = vector.broadcast %10 : vector<1x128xf32> to vector<32x128xf32>
    %29 = arith.addf %27, %28 : vector<32x128xf32>
    %30 = vector.shape_cast %21 : vector<32x128xf32> to vector<4x8x128xf32>
    %31 = vector.shape_cast %25 : vector<32x128xf32> to vector<4x8x128xf32>
    %32 = vector.shape_cast %29 : vector<32x128xf32> to vector<4x8x128xf32>
    %33 = vector.extract_strided_slice %30 {offsets = [0, 0, 0], sizes = [4, 8, 32], strides = [1, 1, 1]} : vector<4x8x128xf32> to vector<4x8x32xf32>
    %34 = vector.extract_strided_slice %31 {offsets = [0, 0, 0], sizes = [4, 8, 32], strides = [1, 1, 1]} : vector<4x8x128xf32> to vector<4x8x32xf32>
    %35 = vector.extract_strided_slice %32 {offsets = [0, 0, 0], sizes = [4, 8, 32], strides = [1, 1, 1]} : vector<4x8x128xf32> to vector<4x8x32xf32>
    "tpu.trace_start"() <{level = 10 : i32, message = "bqd,bkd->bqk"}> : () -> ()
    %cst_21 = arith.constant dense<0.000000e+00> : vector<4x8x8xf32>
    %36 = tpu.matmul %33, %34, %cst_21 {dimension_numbers = #tpu.dot_dimension_numbers<[2], [2], [1], [1], [0, 0, 0, 1, 1, 1], [0], [0]>} : vector<4x8x32xf32>, vector<4x8x32xf32>, vector<4x8x8xf32> -> vector<4x8x8xf32>
    "tpu.trace_stop"() : () -> ()
    %cst_22 = arith.constant dense<0xFF800000> : vector<4x8xf32>
    %37 = vector.multi_reduction <maximumf>, %36, %cst_22 [2] : vector<4x8x8xf32> to vector<4x8xf32>
    %38 = vector.shape_cast %37 : vector<4x8xf32> to vector<4x8x1xf32>
    %39 = vector.broadcast %38 : vector<4x8x1xf32> to vector<4x8x8xf32>
    %40 = arith.subf %36, %39 : vector<4x8x8xf32>
    %41 = math.exp %40 : vector<4x8x8xf32>
    %cst_23 = arith.constant dense<0.000000e+00> : vector<4x8xf32>
    %42 = vector.multi_reduction <add>, %41, %cst_23 [2] : vector<4x8x8xf32> to vector<4x8xf32>
    %43 = vector.shape_cast %42 : vector<4x8xf32> to vector<4x8x1xf32>
    %44 = tpu.reciprocal %43 {approx = true} : vector<4x8x1xf32> -> vector<4x8x1xf32>
    %45 = vector.broadcast %44 : vector<4x8x1xf32> to vector<4x8x8xf32>
    %46 = arith.mulf %41, %45 : vector<4x8x8xf32>
    "tpu.trace_start"() <{level = 10 : i32, message = "bqk,bkd->bqd"}> : () -> ()
    %cst_24 = arith.constant dense<0.000000e+00> : vector<4x8x32xf32>
    %47 = tpu.matmul %46, %35, %cst_24 {dimension_numbers = #tpu.dot_dimension_numbers<[2], [1], [1], [2], [0, 0, 0, 1, 1, 2], [0], [0]>} : vector<4x8x8xf32>, vector<4x8x32xf32>, vector<4x8x32xf32> -> vector<4x8x32xf32>
    "tpu.trace_stop"() : () -> ()
    %c0_25 = arith.constant 0 : index
    %c0_26 = arith.constant 0 : index
    %c0_27 = arith.constant 0 : index
    %48 = vector.load %arg11[%c0_25, %c0_26, %c0_27] : memref<4x8x128xf32, #tpu.memory_space<vmem>>, vector<4x8x32xf32>
    tpu.vector_store %arg11[%c0_25, %c0_26, %c0_27], %47 {strides = array<i32>} : memref<4x8x128xf32, #tpu.memory_space<vmem>>, vector<4x8x32xf32>,
    %49 = vector.extract_strided_slice %30 {offsets = [0, 0, 32], sizes = [4, 8, 32], strides = [1, 1, 1]} : vector<4x8x128xf32> to vector<4x8x32xf32>
    %50 = vector.extract_strided_slice %31 {offsets = [0, 0, 32], sizes = [4, 8, 32], strides = [1, 1, 1]} : vector<4x8x128xf32> to vector<4x8x32xf32>
    %51 = vector.extract_strided_slice %32 {offsets = [0, 0, 32], sizes = [4, 8, 32], strides = [1, 1, 1]} : vector<4x8x128xf32> to vector<4x8x32xf32>
    "tpu.trace_start"() <{level = 10 : i32, message = "bqd,bkd->bqk"}> : () -> ()
    %cst_28 = arith.constant dense<0.000000e+00> : vector<4x8x8xf32>
    %52 = tpu.matmul %49, %50, %cst_28 {dimension_numbers = #tpu.dot_dimension_numbers<[2], [2], [1], [1], [0, 0, 0, 1, 1, 1], [0], [0]>} : vector<4x8x32xf32>, vector<4x8x32xf32>, vector<4x8x8xf32> -> vector<4x8x8xf32>
    "tpu.trace_stop"() : () -> ()
    %cst_29 = arith.constant dense<0xFF800000> : vector<4x8xf32>
    %53 = vector.multi_reduction <maximumf>, %52, %cst_29 [2] : vector<4x8x8xf32> to vector<4x8xf32>
    %54 = vector.shape_cast %53 : vector<4x8xf32> to vector<4x8x1xf32>
    %55 = vector.broadcast %54 : vector<4x8x1xf32> to vector<4x8x8xf32>
    %56 = arith.subf %52, %55 : vector<4x8x8xf32>
    %57 = math.exp %56 : vector<4x8x8xf32>
    %cst_30 = arith.constant dense<0.000000e+00> : vector<4x8xf32>
    %58 = vector.multi_reduction <add>, %57, %cst_30 [2] : vector<4x8x8xf32> to vector<4x8xf32>
    %59 = vector.shape_cast %58 : vector<4x8xf32> to vector<4x8x1xf32>
    %60 = tpu.reciprocal %59 {approx = true} : vector<4x8x1xf32> -> vector<4x8x1xf32>
    %61 = vector.broadcast %60 : vector<4x8x1xf32> to vector<4x8x8xf32>
    %62 = arith.mulf %57, %61 : vector<4x8x8xf32>
    "tpu.trace_start"() <{level = 10 : i32, message = "bqk,bkd->bqd"}> : () -> ()
    %cst_31 = arith.constant dense<0.000000e+00> : vector<4x8x32xf32>
    %63 = tpu.matmul %62, %51, %cst_31 {dimension_numbers = #tpu.dot_dimension_numbers<[2], [1], [1], [2], [0, 0, 0, 1, 1, 2], [0], [0]>} : vector<4x8x8xf32>, vector<4x8x32xf32>, vector<4x8x32xf32> -> vector<4x8x32xf32>
    "tpu.trace_stop"() : () -> ()
    %c0_32 = arith.constant 0 : index
    %c0_33 = arith.constant 0 : index
    %c32 = arith.constant 32 : index
    %64 = vector.load %arg11[%c0_32, %c0_33, %c32] : memref<4x8x128xf32, #tpu.memory_space<vmem>>, vector<4x8x32xf32>
    tpu.vector_store %arg11[%c0_32, %c0_33, %c32], %63 {strides = array<i32>} : memref<4x8x128xf32, #tpu.memory_space<vmem>>, vector<4x8x32xf32>,
    %65 = vector.extract_strided_slice %30 {offsets = [0, 0, 64], sizes = [4, 8, 32], strides = [1, 1, 1]} : vector<4x8x128xf32> to vector<4x8x32xf32>
    %66 = vector.extract_strided_slice %31 {offsets = [0, 0, 64], sizes = [4, 8, 32], strides = [1, 1, 1]} : vector<4x8x128xf32> to vector<4x8x32xf32>
    %67 = vector.extract_strided_slice %32 {offsets = [0, 0, 64], sizes = [4, 8, 32], strides = [1, 1, 1]} : vector<4x8x128xf32> to vector<4x8x32xf32>
    "tpu.trace_start"() <{level = 10 : i32, message = "bqd,bkd->bqk"}> : () -> ()
    %cst_34 = arith.constant dense<0.000000e+00> : vector<4x8x8xf32>
    %68 = tpu.matmul %65, %66, %cst_34 {dimension_numbers = #tpu.dot_dimension_numbers<[2], [2], [1], [1], [0, 0, 0, 1, 1, 1], [0], [0]>} : vector<4x8x32xf32>, vector<4x8x32xf32>, vector<4x8x8xf32> -> vector<4x8x8xf32>
    "tpu.trace_stop"() : () -> ()
    %cst_35 = arith.constant dense<0xFF800000> : vector<4x8xf32>
    %69 = vector.multi_reduction <maximumf>, %68, %cst_35 [2] : vector<4x8x8xf32> to vector<4x8xf32>
    %70 = vector.shape_cast %69 : vector<4x8xf32> to vector<4x8x1xf32>
    %71 = vector.broadcast %70 : vector<4x8x1xf32> to vector<4x8x8xf32>
    %72 = arith.subf %68, %71 : vector<4x8x8xf32>
    %73 = math.exp %72 : vector<4x8x8xf32>
    %cst_36 = arith.constant dense<0.000000e+00> : vector<4x8xf32>
    %74 = vector.multi_reduction <add>, %73, %cst_36 [2] : vector<4x8x8xf32> to vector<4x8xf32>
    %75 = vector.shape_cast %74 : vector<4x8xf32> to vector<4x8x1xf32>
    %76 = tpu.reciprocal %75 {approx = true} : vector<4x8x1xf32> -> vector<4x8x1xf32>
    %77 = vector.broadcast %76 : vector<4x8x1xf32> to vector<4x8x8xf32>
    %78 = arith.mulf %73, %77 : vector<4x8x8xf32>
    "tpu.trace_start"() <{level = 10 : i32, message = "bqk,bkd->bqd"}> : () -> ()
    %cst_37 = arith.constant dense<0.000000e+00> : vector<4x8x32xf32>
    %79 = tpu.matmul %78, %67, %cst_37 {dimension_numbers = #tpu.dot_dimension_numbers<[2], [1], [1], [2], [0, 0, 0, 1, 1, 2], [0], [0]>} : vector<4x8x8xf32>, vector<4x8x32xf32>, vector<4x8x32xf32> -> vector<4x8x32xf32>
    "tpu.trace_stop"() : () -> ()
    %c0_38 = arith.constant 0 : index
    %c0_39 = arith.constant 0 : index
    %c64 = arith.constant 64 : index
    %80 = vector.load %arg11[%c0_38, %c0_39, %c64] : memref<4x8x128xf32, #tpu.memory_space<vmem>>, vector<4x8x32xf32>
    tpu.vector_store %arg11[%c0_38, %c0_39, %c64], %79 {strides = array<i32>} : memref<4x8x128xf32, #tpu.memory_space<vmem>>, vector<4x8x32xf32>,
    %81 = vector.extract_strided_slice %30 {offsets = [0, 0, 96], sizes = [4, 8, 32], strides = [1, 1, 1]} : vector<4x8x128xf32> to vector<4x8x32xf32>
    %82 = vector.extract_strided_slice %31 {offsets = [0, 0, 96], sizes = [4, 8, 32], strides = [1, 1, 1]} : vector<4x8x128xf32> to vector<4x8x32xf32>
    %83 = vector.extract_strided_slice %32 {offsets = [0, 0, 96], sizes = [4, 8, 32], strides = [1, 1, 1]} : vector<4x8x128xf32> to vector<4x8x32xf32>
    "tpu.trace_start"() <{level = 10 : i32, message = "bqd,bkd->bqk"}> : () -> ()
    %cst_40 = arith.constant dense<0.000000e+00> : vector<4x8x8xf32>
    %84 = tpu.matmul %81, %82, %cst_40 {dimension_numbers = #tpu.dot_dimension_numbers<[2], [2], [1], [1], [0, 0, 0, 1, 1, 1], [0], [0]>} : vector<4x8x32xf32>, vector<4x8x32xf32>, vector<4x8x8xf32> -> vector<4x8x8xf32>
    "tpu.trace_stop"() : () -> ()
    %cst_41 = arith.constant dense<0xFF800000> : vector<4x8xf32>
    %85 = vector.multi_reduction <maximumf>, %84, %cst_41 [2] : vector<4x8x8xf32> to vector<4x8xf32>
    %86 = vector.shape_cast %85 : vector<4x8xf32> to vector<4x8x1xf32>
    %87 = vector.broadcast %86 : vector<4x8x1xf32> to vector<4x8x8xf32>
    %88 = arith.subf %84, %87 : vector<4x8x8xf32>
    %89 = math.exp %88 : vector<4x8x8xf32>
    %cst_42 = arith.constant dense<0.000000e+00> : vector<4x8xf32>
    %90 = vector.multi_reduction <add>, %89, %cst_42 [2] : vector<4x8x8xf32> to vector<4x8xf32>
    %91 = vector.shape_cast %90 : vector<4x8xf32> to vector<4x8x1xf32>
    %92 = tpu.reciprocal %91 {approx = true} : vector<4x8x1xf32> -> vector<4x8x1xf32>
    %93 = vector.broadcast %92 : vector<4x8x1xf32> to vector<4x8x8xf32>
    %94 = arith.mulf %89, %93 : vector<4x8x8xf32>
    "tpu.trace_start"() <{level = 10 : i32, message = "bqk,bkd->bqd"}> : () -> ()
    %cst_43 = arith.constant dense<0.000000e+00> : vector<4x8x32xf32>
    %95 = tpu.matmul %94, %83, %cst_43 {dimension_numbers = #tpu.dot_dimension_numbers<[2], [1], [1], [2], [0, 0, 0, 1, 1, 2], [0], [0]>} : vector<4x8x8xf32>, vector<4x8x32xf32>, vector<4x8x32xf32> -> vector<4x8x32xf32>
    "tpu.trace_stop"() : () -> ()
    %c0_44 = arith.constant 0 : index
    %c0_45 = arith.constant 0 : index
    %c96 = arith.constant 96 : index
    %96 = vector.load %arg11[%c0_44, %c0_45, %c96] : memref<4x8x128xf32, #tpu.memory_space<vmem>>, vector<4x8x32xf32>
    tpu.vector_store %arg11[%c0_44, %c0_45, %c96], %95 {strides = array<i32>} : memref<4x8x128xf32, #tpu.memory_space<vmem>>, vector<4x8x32xf32>,
    %c0_46 = arith.constant 0 : index
    %c0_47 = arith.constant 0 : index
    %c0_48 = arith.constant 0 : index
    %97 = vector.load %arg11[%c0_46, %c0_47, %c0_48] : memref<4x8x128xf32, #tpu.memory_space<vmem>>, vector<4x8x128xf32>
    %98 = vector.shape_cast %97 : vector<4x8x128xf32> to vector<32x128xf32>
    %c0_49 = arith.constant 0 : index
    %c0_50 = arith.constant 0 : index
    %99 = vector.load %arg8[%c0_49, %c0_50] : memref<128x128xf32, #tpu.memory_space<vmem>>, vector<128x128xf32>
    %cst_51 = arith.constant dense<0.000000e+00> : vector<32x128xf32>
    %100 = tpu.matmul %98, %99, %cst_51 {dimension_numbers = #tpu.dot_dimension_numbers<[1], [0], [0], [1], [0, 0, 1, 1], [], []>} : vector<32x128xf32>, vector<128x128xf32>, vector<32x128xf32> -> vector<32x128xf32>
    %101 = vector.broadcast %11 : vector<1x128xf32> to vector<32x128xf32>
    %102 = arith.addf %100, %101 : vector<32x128xf32>
    %103 = arith.addf %17, %102 : vector<32x128xf32>
    %cst_52 = arith.constant dense<0.000000e+00> : vector<32xf32>
    %104 = vector.multi_reduction <add>, %103, %cst_52 [1] : vector<32x128xf32> to vector<32xf32>
    %105 = vector.shape_cast %104 : vector<32xf32> to vector<32x1xf32>
    %cst_53 = arith.constant 1.280000e+02 : f32
    %106 = vector.broadcast %cst_53 : f32 to vector<32x1xf32>
    %107 = arith.divf %105, %106 : vector<32x1xf32>
    %108 = vector.broadcast %107 : vector<32x1xf32> to vector<32x128xf32>
    %109 = arith.subf %103, %108 : vector<32x128xf32>
    %110 = arith.mulf %109, %109 : vector<32x128xf32>
    %cst_54 = arith.constant dense<0.000000e+00> : vector<32xf32>
    %111 = vector.multi_reduction <add>, %110, %cst_54 [1] : vector<32x128xf32> to vector<32xf32>
    %112 = vector.shape_cast %111 : vector<32xf32> to vector<32x1xf32>
    %cst_55 = arith.constant 1.280000e+02 : f32
    %113 = vector.broadcast %cst_55 : f32 to vector<32x1xf32>
    %114 = arith.divf %112, %113 : vector<32x1xf32>
    %cst_56 = arith.constant 9.99999974E-6 : f32
    %115 = vector.broadcast %cst_56 : f32 to vector<32x1xf32>
    %116 = arith.addf %114, %115 : vector<32x1xf32>
    %117 = math.rsqrt %116 : vector<32x1xf32>
    %118 = vector.broadcast %117 : vector<32x1xf32> to vector<32x128xf32>
    %119 = arith.mulf %109, %118 : vector<32x128xf32>
    %120 = vector.broadcast %12 : vector<1x128xf32> to vector<32x128xf32>
    %121 = arith.mulf %119, %120 : vector<32x128xf32>
    %122 = vector.broadcast %13 : vector<1x128xf32> to vector<32x128xf32>
    %123 = arith.addf %121, %122 : vector<32x128xf32>
    %124 = vector.shape_cast %123 : vector<32x128xf32> to vector<4x8x128xf32>
    %c0_57 = arith.constant 0 : index
    %c0_58 = arith.constant 0 : index
    %c0_59 = arith.constant 0 : index
    %125 = vector.load %arg10[%c0_57, %c0_58, %c0_59] : memref<4x8x128xf32, #tpu.memory_space<vmem>>, vector<4x8x128xf32>
    tpu.vector_store %arg10[%c0_57, %c0_58, %c0_59], %124 {strides = array<i32>} : memref<4x8x128xf32, #tpu.memory_space<vmem>>, vector<4x8x128xf32>,
    return
  }
  func.func @transform_0(%arg0: i32) -> (i32, i32, i32) {
    %c0_i32 = arith.constant 0 : i32
    %c0_i32_0 = arith.constant 0 : i32
    %c0_i32_1 = arith.constant 0 : i32
    return %arg0, %c0_i32, %c0_i32_0 : i32, i32, i32
  }
  func.func @transform_1(%arg0: i32) -> (i32, i32, i32) {
    %c0_i32 = arith.constant 0 : i32
    %c0_i32_0 = arith.constant 0 : i32
    %c0_i32_1 = arith.constant 0 : i32
    return %arg0, %c0_i32, %c0_i32_0 : i32, i32, i32
  }
  func.func @transform_2(%arg0: i32) -> (i32, i32, i32) {
    %c0_i32 = arith.constant 0 : i32
    %c0_i32_0 = arith.constant 0 : i32
    %c0_i32_1 = arith.constant 0 : i32
    return %arg0, %c0_i32, %c0_i32_0 : i32, i32, i32
  }
  func.func @transform_3(%arg0: i32) -> (i32, i32) {
    %c0_i32 = arith.constant 0 : i32
    %c0_i32_0 = arith.constant 0 : i32
    %c0_i32_1 = arith.constant 0 : i32
    return %c0_i32, %c0_i32_0 : i32, i32
  }
  func.func @transform_4(%arg0: i32) -> (i32, i32) {
    %c0_i32 = arith.constant 0 : i32
    %c0_i32_0 = arith.constant 0 : i32
    %c0_i32_1 = arith.constant 0 : i32
    return %c0_i32, %c0_i32_0 : i32, i32
  }
  func.func @transform_5(%arg0: i32) -> (i32, i32) {
    %c0_i32 = arith.constant 0 : i32
    %c0_i32_0 = arith.constant 0 : i32
    %c0_i32_1 = arith.constant 0 : i32
    return %c0_i32, %c0_i32_0 : i32, i32
  }
  func.func @transform_6(%arg0: i32) -> (i32, i32) {
    %c0_i32 = arith.constant 0 : i32
    %c0_i32_0 = arith.constant 0 : i32
    %c0_i32_1 = arith.constant 0 : i32
    return %c0_i32, %c0_i32_0 : i32, i32
  }
  func.func @transform_7(%arg0: i32) -> (i32, i32) {
    %c0_i32 = arith.constant 0 : i32
    %c0_i32_0 = arith.constant 0 : i32
    %c0_i32_1 = arith.constant 0 : i32
    return %c0_i32, %c0_i32_0 : i32, i32
  }
  func.func @transform_8(%arg0: i32) -> (i32, i32) {
    %c0_i32 = arith.constant 0 : i32
    %c0_i32_0 = arith.constant 0 : i32
    %c0_i32_1 = arith.constant 0 : i32
    return %c0_i32, %c0_i32_0 : i32, i32
  }
  func.func @transform_9(%arg0: i32) -> (i32, i32, i32) {
    %c0_i32 = arith.constant 0 : i32
    %c0_i32_0 = arith.constant 0 : i32
    %c0_i32_1 = arith.constant 0 : i32
    return %arg0, %c0_i32, %c0_i32_0 : i32, i32, i32
  }
}

</mosaic_0001>

<bundles_post_ra>
// kernel: tpu_custom_call.1
= control target key start
LH: loop header
LB: loop body
LE: loop exit
PB: predicated region body
PF: predicated region fallthrough
CT: control target
= control target key end

     0   :  { %14 = vsyncpa [#allocation4], 0  ;;  %s4936_s0 = inlined_call_operand.hbm [shape: f32[4,8,64], index: 0, kind: input, shape index: {}]   ;;  %s4937_s1 = inlined_call_operand.hbm [shape: f32[4,8,48], index: 1, kind: input, shape index: {}]   ;;  %s4938_s2 = inlined_call_operand.hbm [shape: f32[4,8,48], index: 2, kind: input, shape index: {}]   ;;  %s4939_s3 = inlined_call_operand.hbm [shape: f32[64,128], index: 3, kind: input, shape index: {}]   ;;  %s4940_s4 = inlined_call_operand.hbm [shape: f32[64,128], index: 4, kind: input, shape index: {}]   ;;  %s4941_s5 = inlined_call_operand.hbm [shape: f32[48,128], index: 5, kind: input, shape index: {}]   ;;  %s4942_s6 = inlined_call_operand.hbm [shape: f32[48,128], index: 6, kind: input, shape index: {}]   ;;  %s4943_s7 = inlined_call_operand.hbm [shape: f32[128,128], index: 7, kind: input, shape index: {}]   ;;  %s4944_s8 = inlined_call_operand.vmem [shape: f32[8,128], index: 8, kind: input, shape index: {}]   ;;  %s4945_s9 = inlined_call_operand.hbm [shape: f32[4,8,128], index: 9, kind: output, shape index: {}]  }
   0x1   :  { %15 = vsyncpa [#allocation7], 0 }
   0x2   :  { %16 = vsyncpa [#allocation10], 0 }
   0x3   :  { %17 = vsyncpa [#allocation13], 0 }
   0x4   :  { %18 = vsyncpa [#allocation16], 0 }
   0x5   :  { %19 = vsyncpa [#allocation5], 0  ;;  %s4338_s30 = smov [#allocation6]   ;;  %s4339_s11 = smov [#allocation9]  }
   0x6   :  { %s37_s10 = sshll.u32 %s4338_s30, 4  ;;  %s61_s12 = sshll.u32 %s4339_s11, 4  ;;  %s38_s10 = int_to_ptr.vmem [resolvable:$true] %s37_s10  ;;  %s4404_s12 = int_to_ptr.vmem [resolvable:$true] %s61_s12 }
   0x7   :  { %s4128_s15 = scalar_lea.hbm %s4937_s1, 512 }
   0x8   :  { %p4129_p0 = scmp.ne.s32.totalorder %s4937_s1, %s4128_s15  ;;  %p4132_p1 = scmp.lt.u32.totalorder %s4128_s15, %s4937_s1 }
   0xa   :  { %p4134_p2 = pnand %p4132_p1, %p4129_p0 }
   0xc   :  { %4137 = shalt.err (!%p4134_p2)
}
   0xd   :  { %s4138_s20 = scalar_lea.vmem %s38_s10, 512  ;;  %p4143_p4 = scmp.lt.s32.totalorder %s38_s10, %s38_s10 }
   0xe   :  { %p4139_p3 = scmp.ne.s32.totalorder %s38_s10, %s4138_s20  ;;  %p4144_p5 = scmp.lt.s32.totalorder %s4138_s20, %s4138_s20 }
  0x10   :  { %p4145_p6 = por %p4144_p5, %p4143_p4 }
  0x12   :  { %p4146_p7 = pnand %p4145_p6, %p4139_p3 }
  0x14   :  { %4149 = shalt.err (!%p4146_p7)
}
  0x15   :  { %s4340_s21 = smov 128   ;;  %s4341_s22 = smov 8  }
  0x16   :  { %43 = dma.hbm_to_vmem [thread:$0]  %s4937_s1, 512, %s38_s10, [#allocation7], %s4340_s21, %s4340_s21, %s4341_s22  }
  0x17   :  { %s4150_s27 = scalar_lea.hbm %s4939_s3, 1024 }
  0x18   :  { %p4151_p8 = scmp.ne.s32.totalorder %s4939_s3, %s4150_s27  ;;  %p4154_p9 = scmp.lt.u32.totalorder %s4150_s27, %s4939_s3 }
  0x1a   :  { %p4156_p10 = pnand %p4154_p9, %p4151_p8 }
  0x1c   :  { %4159 = shalt.err (!%p4156_p10)
}
  0x1d   :  { %s4160_s13 = scalar_lea.vmem %s4404_s12, 1024  ;;  %p4165_p12 = scmp.lt.s32.totalorder %s4404_s12, %s4404_s12 }
  0x1e   :  { %p4161_p11 = scmp.ne.s32.totalorder %s4404_s12, %s4160_s13  ;;  %p4166_p13 = scmp.lt.s32.totalorder %s4160_s13, %s4160_s13 }
  0x20   :  { %p4167_p0 = por %p4166_p13, %p4165_p12 }
  0x22   :  { %p4168_p1 = pnand %p4167_p0, %p4161_p11 }
  0x24   :  { %4171 = shalt.err (!%p4168_p1)
}
  0x25   :  { %67 = dma.hbm_to_vmem [thread:$0]  %s4939_s3, 1024, %s4404_s12, [#allocation10], %s4340_s21, %s4340_s21, %s4341_s22  }
  0x26   :  { %s4342_s14 = smov [#allocation12]   ;;  %s4343_s16 = smov [#allocation3]  }
  0x27   :  { %s85_s15 = sshll.u32 %s4342_s14, 4  ;;  %s25_s17 = sshll.u32 %s4343_s16, 4  ;;  %s86_s15 = int_to_ptr.vmem [resolvable:$true] %s85_s15  ;;  %s4441_s17 = int_to_ptr.vmem [resolvable:$true] %s25_s17 }
  0x28   :  { %s4172_s20 = scalar_lea.hbm %s4941_s5, 768 }
  0x29   :  { %p4173_p2 = scmp.ne.s32.totalorder %s4941_s5, %s4172_s20  ;;  %p4176_p3 = scmp.lt.u32.totalorder %s4172_s20, %s4941_s5 }
  0x2b   :  { %p4178_p4 = pnand %p4176_p3, %p4173_p2 }
  0x2d   :  { %4181 = shalt.err (!%p4178_p4)
}
  0x2e   :  { %s4182_s3 = scalar_lea.vmem %s86_s15, 768  ;;  %p4187_p6 = scmp.lt.s32.totalorder %s86_s15, %s86_s15 }
  0x2f   :  { %p4183_p5 = scmp.ne.s32.totalorder %s86_s15, %s4182_s3  ;;  %p4188_p7 = scmp.lt.s32.totalorder %s4182_s3, %s4182_s3 }
  0x31   :  { %p4189_p8 = por %p4188_p7, %p4187_p6 }
  0x33   :  { %p4190_p9 = pnand %p4189_p8, %p4183_p5 }
  0x35   :  { %4193 = shalt.err (!%p4190_p9)
}
  0x36   :  { %91 = dma.hbm_to_vmem [thread:$0]  %s4941_s5, 768, %s86_s15, [#allocation13], %s4340_s21, %s4340_s21, %s4341_s22  }
  0x37   :  { %s4194_s30 = scalar_lea.hbm %s4936_s0, 512 }
  0x38   :  { %p4195_p10 = scmp.ne.s32.totalorder %s4936_s0, %s4194_s30  ;;  %p4198_p11 = scmp.lt.u32.totalorder %s4194_s30, %s4936_s0 }
  0x3a   :  { %p4200_p12 = pnand %p4198_p11, %p4195_p10 }
  0x3c   :  { %4203 = shalt.err (!%p4200_p12)
}
  0x3d   :  { %s4204_s14 = scalar_lea.vmem %s4441_s17, 512  ;;  %p4209_p0 = scmp.lt.s32.totalorder %s4441_s17, %s4441_s17 }
  0x3e   :  { %p4205_p13 = scmp.ne.s32.totalorder %s4441_s17, %s4204_s14  ;;  %p4210_p1 = scmp.lt.s32.totalorder %s4204_s14, %s4204_s14 }
  0x40   :  { %p4211_p2 = por %p4210_p1, %p4209_p0 }
  0x42   :  { %p4212_p3 = pnand %p4211_p2, %p4205_p13 }
  0x44   :  { %4215 = shalt.err (!%p4212_p3)
}
  0x45   :  { %31 = dma.hbm_to_vmem [thread:$0]  %s4936_s0, 512, %s4441_s17, [#allocation4], %s4340_s21, %s4340_s21, %s4341_s22  }
  0x46   :  { %s4344_s16 = smov [#allocation8]   ;;  %s4345_s19 = smov [#allocation11]  }
  0x47   :  { %s49_s18 = sshll.u32 %s4344_s16, 4  ;;  %s73_s20 = sshll.u32 %s4345_s19, 4  ;;  %s50_s18 = int_to_ptr.vmem [resolvable:$true] %s49_s18  ;;  %s4478_s20 = int_to_ptr.vmem [resolvable:$true] %s73_s20 }
  0x48   :  { %s4216_s25 = scalar_lea.hbm %s4938_s2, 512 }
  0x49   :  { %p4217_p4 = scmp.ne.s32.totalorder %s4938_s2, %s4216_s25  ;;  %p4220_p5 = scmp.lt.u32.totalorder %s4216_s25, %s4938_s2 }
  0x4b   :  { %p4222_p6 = pnand %p4220_p5, %p4217_p4 }
  0x4d   :  { %4225 = shalt.err (!%p4222_p6)
}
  0x4e   :  { %s4226_s0 = scalar_lea.vmem %s50_s18, 512  ;;  %p4231_p8 = scmp.lt.s32.totalorder %s50_s18, %s50_s18 }
  0x4f   :  { %p4227_p7 = scmp.ne.s32.totalorder %s50_s18, %s4226_s0  ;;  %p4232_p9 = scmp.lt.s32.totalorder %s4226_s0, %s4226_s0 }
  0x51   :  { %p4233_p10 = por %p4232_p9, %p4231_p8 }
  0x53   :  { %p4234_p11 = pnand %p4233_p10, %p4227_p7 }
  0x55   :  { %4237 = shalt.err (!%p4234_p11)
}
  0x56   :  { %55 = dma.hbm_to_vmem [thread:$0]  %s4938_s2, 512, %s50_s18, [#allocation7], %s4340_s21, %s4340_s21, %s4341_s22  }
  0x57   :  { %s4238_s11 = scalar_lea.hbm %s4940_s4, 1024 }
  0x58   :  { %p4239_p12 = scmp.ne.s32.totalorder %s4940_s4, %s4238_s11  ;;  %p4242_p13 = scmp.lt.u32.totalorder %s4238_s11, %s4940_s4 }
  0x5a   :  { %p4244_p0 = pnand %p4242_p13, %p4239_p12 }
  0x5c   :  { %4247 = shalt.err (!%p4244_p0)
}
  0x5d   :  { %s4248_s5 = scalar_lea.vmem %s4478_s20, 1024  ;;  %p4253_p2 = scmp.lt.s32.totalorder %s4478_s20, %s4478_s20 }
  0x5e   :  { %p4249_p1 = scmp.ne.s32.totalorder %s4478_s20, %s4248_s5  ;;  %p4254_p3 = scmp.lt.s32.totalorder %s4248_s5, %s4248_s5 }
  0x60   :  { %p4255_p4 = por %p4254_p3, %p4253_p2 }
  0x62   :  { %p4256_p5 = pnand %p4255_p4, %p4249_p1 }
  0x64   :  { %4259 = shalt.err (!%p4256_p5)
}
  0x65   :  { %79 = dma.hbm_to_vmem [thread:$0]  %s4940_s4, 1024, %s4478_s20, [#allocation10], %s4340_s21, %s4340_s21, %s4341_s22  }
  0x66   :  { %s4346_s16 = smov [#allocation14]   ;;  %s4347_s19 = smov [#allocation15]  }
  0x67   :  { %s97_s18 = sshll.u32 %s4346_s16, 4  ;;  %s109_s23 = sshll.u32 %s4347_s19, 4  ;;  %s98_s18 = int_to_ptr.vmem [resolvable:$true] %s97_s18  ;;  %s4515_s23 = int_to_ptr.vmem [resolvable:$true] %s109_s23 }
  0x68   :  { %s4260_s26 = scalar_lea.hbm %s4942_s6, 768 }
  0x69   :  { %p4261_p6 = scmp.ne.s32.totalorder %s4942_s6, %s4260_s26  ;;  %p4264_p7 = scmp.lt.u32.totalorder %s4260_s26, %s4942_s6 }
  0x6b   :  { %p4266_p8 = pnand %p4264_p7, %p4261_p6 }
  0x6d   :  { %4269 = shalt.err (!%p4266_p8)
}
  0x6e   :  { %s4270_s4 = scalar_lea.vmem %s98_s18, 768  ;;  %p4275_p10 = scmp.lt.s32.totalorder %s98_s18, %s98_s18 }
  0x6f   :  { %p4271_p9 = scmp.ne.s32.totalorder %s98_s18, %s4270_s4  ;;  %p4276_p11 = scmp.lt.s32.totalorder %s4270_s4, %s4270_s4 }
  0x71   :  { %p4277_p12 = por %p4276_p11, %p4275_p10 }
  0x73   :  { %p4278_p13 = pnand %p4277_p12, %p4271_p9 }
  0x75   :  { %4281 = shalt.err (!%p4278_p13)
}
  0x76   :  { %103 = dma.hbm_to_vmem [thread:$0]  %s4942_s6, 768, %s98_s18, [#allocation13], %s4340_s21, %s4340_s21, %s4341_s22  }
  0x77   :  { %s4282_s30 = scalar_lea.hbm %s4943_s7, 2048 }
  0x78   :  { %p4283_p0 = scmp.ne.s32.totalorder %s4943_s7, %s4282_s30  ;;  %p4286_p1 = scmp.lt.u32.totalorder %s4282_s30, %s4943_s7 }
  0x7a   :  { %p4288_p2 = pnand %p4286_p1, %p4283_p0 }
  0x7c   :  { %4291 = shalt.err (!%p4288_p2)
}
  0x7d   :  { %s4292_s14 = scalar_lea.vmem %s4515_s23, 2048  ;;  %p4297_p4 = scmp.lt.s32.totalorder %s4515_s23, %s4515_s23 }
  0x7e   :  { %p4293_p3 = scmp.ne.s32.totalorder %s4515_s23, %s4292_s14  ;;  %p4298_p5 = scmp.lt.s32.totalorder %s4292_s14, %s4292_s14 }
  0x80   :  { %p4299_p6 = por %p4298_p5, %p4297_p4 }
  0x82   :  { %p4300_p7 = pnand %p4299_p6, %p4293_p3 }
  0x84   :  { %4303 = shalt.err (!%p4300_p7)
}
  0x85   :  { %115 = dma.hbm_to_vmem [thread:$0]  %s4943_s7, 2048, %s4515_s23, [#allocation16], %s4340_s21, %s4340_s21, %s4341_s22  }
  0x86   :  { %4326 = dma.done.wait [#allocation4], 512  }
  0x87   :  { %4327 = vsyncadd [#allocation4], 4294966784 }
  0x88   :  { %4328 = dma.done.wait [#allocation7], 1024  }
  0x89   :  { %4329 = vsyncadd [#allocation7], 4294966272 }
  0x8a   :  { %4330 = dma.done.wait [#allocation10], 2048  }
  0x8b   :  { %4331 = vsyncadd [#allocation10], 4294965248 }
  0x8c   :  { %4332 = dma.done.wait [#allocation13], 1536  }
  0x8d   :  { %4333 = vsyncadd [#allocation13], 4294965760 }
  0x8e   :  { %4334 = dma.done.wait [#allocation16], 2048  }
  0x8f   :  { %4335 = vsyncadd [#allocation16], 4294965248  ;;  %v155_v0 = vld [vmem:[#allocation9] sm:$0xff]  ;;  %v156_v1 = vld [vmem:[#allocation9 + $0x8] sm:$0xff]  ;;  %vm167_vm0 = vcmask 523264   ;;  %vm372_vm1 = vcmask 392192   ;;  %v163_v55 = vlaneseq }
  0x90   :  { %v157_v2 = vld [vmem:[#allocation9 + $0x10] sm:$0xff]  ;;  %v3939_v3 = vpack.c.bf16 %v156_v1, %v155_v0  ;;  %v158_v4 = vld [vmem:[#allocation9 + $0x18] sm:$0xff]  ;;  %v159_v6 = vld [vmem:[#allocation9 + $0x20] sm:$0xff]  ;;  %v4348_v52 = vmov 0.0   ;;  %vm4349_vm2 = vmmov 0   ;;  %vm577_vm3 = vcmask 261120  }
  0x91   :  { %v3943_v5 = vpack.c.bf16 %v158_v4, %v157_v2  ;;  %v160_v7 = vld [vmem:[#allocation9 + $0x28] sm:$0xff]  ;;  %v362_v8 = vld [vmem:[#allocation12] sm:$0xff]  ;;  %v364_v12 = vld [vmem:[#allocation12 + $0x10] sm:$0xff]  ;;  %v4574_v56 = vshrl.u32 %v163_v55, 7  ;;  %vm882_vm4 = vcmask 64512   ;;  %s4350_s15 = smov 96  }
  0x92   :  { %3940 = vmatprep.subr.bf16.mxu1 %v3939_v3  ;;  %v363_v9 = vld [vmem:[#allocation12 + $0x8] sm:$0xff]  ;;  %v142_v10 = vld [vmem:[#allocation3] sm:$0xff]  ;;  %v3947_v13 = vpack.c.bf16 %v160_v7, %v159_v6  ;;  %v161_v14 = vld [vmem:[#allocation9 + $0x30] sm:$0xff]  ;;  %s4351_s16 = smov 64   ;;  %s4352_s18 = smov 32   ;;  %vm1903_vm5 = vcmask 523520  }
  0x93   :  { %3942 = vmatpush3.bf16.msra.mxu1 %v3939_v3  ;;  %v3971_v11 = vpack.c.bf16 %v363_v9, %v362_v8  ;;  %3677 = vmatprep.mubr.msk.f32.mxu1 %vm167_vm0, %v142_v10  ;;  %v365_v15 = vld [vmem:[#allocation12 + $0x18] sm:$0xff]  ;;  %v366_v18 = vld [vmem:[#allocation12 + $0x20] sm:$0xff]  ;;  %v367_v19 = vld [vmem:[#allocation12 + $0x28] sm:$0xff]  ;;  %v370_v57 = vsub.s32 2, %v4574_v56  ;;  %v275_v6 = vsub.s32 1, %v4574_v56  ;;  %vm2584_vm6 = vcmask 785920  }
  0x94   :  { %3944 = vmatprep.subr.bf16.mxu1 %v3943_v5  ;;  %v162_v16 = vld [vmem:[#allocation9 + $0x38] sm:$0xff]  ;;  %v3975_v17 = vpack.c.bf16 %v365_v15, %v364_v12  ;;  %v146_v20 = vld [vmem:[#allocation6] sm:$0xff]  ;;  %v3979_v21 = vpack.c.bf16 %v367_v19, %v366_v18  ;;  %v266_v24 = vld [vmem:[#allocation11 + $0x8] sm:$0xff]  ;;  %v478_v18 = vsub.s32 3, %v4574_v56  ;;  %vm3265_vm7 = vcmask 1048320  }
  0x95   :  { %3972 = vmatprep.subr.bf16.mxu0 %v3971_v11  ;;  %v3951_v22 = vpack.c.bf16 %v162_v16, %v161_v14  ;;  %3717 = vmatprep.mubr.msk.f32.mxu0 %vm372_vm1, %v146_v20  ;;  %v265_v23 = vld [vmem:[#allocation11] sm:$0xff]  ;;  %v267_v26 = vld [vmem:[#allocation11 + $0x10] sm:$0xff]  ;;  %v268_v27 = vld [vmem:[#allocation11 + $0x18] sm:$0xff] }
  0x96   :  { %3974 = vmatpush3.bf16.msra.mxu0 %v3971_v11  ;;  %v3955_v25 = vpack.c.bf16 %v266_v24, %v265_v23  ;;  %v147_v28 = vld [vmem:[#allocation6 + $0x8] sm:$0xff]  ;;  %v148_v30 = vld [vmem:[#allocation6 + $0x10] sm:$0xff]  ;;  %v3959_v31 = vpack.c.bf16 %v268_v27, %v267_v26  ;;  %v269_v33 = vld [vmem:[#allocation11 + $0x20] sm:$0xff] }
  0x97   :  { %3946 = vmatpush3.bf16.msra.mxu1 %v3943_v5  ;;  %3976 = vmatprep.subr.bf16.mxu0 %v3975_v17  ;;  %v143_v29 = vld [vmem:[#allocation3 + $0x8] sm:$0xff]  ;;  %v144_v32 = vld [vmem:[#allocation3 + $0x10] sm:$0xff]  ;;  %v149_v35 = vld [vmem:[#allocation6 + $0x18] sm:$0xff] }
  0x98   :  { %3948 = vmatprep.subr.bf16.mxu1 %v3947_v13  ;;  %v270_v34 = vld [vmem:[#allocation11 + $0x28] sm:$0xff]  ;;  %v145_v36 = vld [vmem:[#allocation3 + $0x18] sm:$0xff]  ;;  %v271_v38 = vld [vmem:[#allocation11 + $0x30] sm:$0xff] }
  0x99   :  { %v3963_v37 = vpack.c.bf16 %v270_v34, %v269_v33  ;;  %v272_v39 = vld [vmem:[#allocation11 + $0x38] sm:$0xff]  ;;  %v470_v41 = vld [vmem:[#allocation14] sm:$0xff]  ;;  %v472_v44 = vld [vmem:[#allocation14 + $0x10] sm:$0xff] }
  0x9a   :  { %3978 = vmatpush3.bf16.msra.mxu0 %v3975_v17  ;;  %v3967_v40 = vpack.c.bf16 %v272_v39, %v271_v38  ;;  %v471_v42 = vld [vmem:[#allocation14 + $0x8] sm:$0xff]  ;;  %v473_v45 = vld [vmem:[#allocation14 + $0x18] sm:$0xff]  ;;  %v474_v47 = vld [vmem:[#allocation14 + $0x20] sm:$0xff] }
  0x9b   :  { %3950 = vmatpush3.bf16.msra.mxu1 %v3947_v13  ;;  %3980 = vmatprep.subr.bf16.mxu0 %v3979_v21  ;;  %v3983_v43 = vpack.c.bf16 %v471_v42, %v470_v41  ;;  %v3987_v46 = vpack.c.bf16 %v473_v45, %v472_v44  ;;  %v475_v48 = vld [vmem:[#allocation14 + $0x28] sm:$0xff]  ;;  %v150_v49 = vld [vmem:[#allocation8] sm:$0xff]  ;;  %v151_v51 = vld [vmem:[#allocation8 + $0x8] sm:$0xff] }
  0x9c   :  { %3952 = vmatprep.subr.bf16.mxu1 %v3951_v22  ;;  %v3991_v50 = vpack.c.bf16 %v475_v48, %v474_v47  ;;  %v152_v53 = vld [vmem:[#allocation8 + $0x10] sm:$0xff]  ;;  %v153_v54 = vld [vmem:[#allocation8 + $0x18] sm:$0xff]  ;;  %v154_v58 = vld [vmem:[%s4944_s8] sm:$0xff] }
  0x9d   :  { %v371_v59 = vrot.slane %v154_v58, %v370_v57  ;;  %v276_v7 = vrot.slane %v154_v58, %v275_v6  ;;  %v479_v19 = vrot.slane %v154_v58, %v478_v18 }
  0x9e   :  { %3982 = vmatpush3.bf16.msra.mxu0 %v3979_v21 }
  0x9f   :  { %3954 = vmatpush3.bf16.msra.mxu1 %v3951_v22  ;;  %3741 = vmatprep.subr.mxu0 %v4348_v52 }
  0xa0   :  { %3956 = vmatprep.subr.bf16.mxu1 %v3955_v25 }
  0xa1   :  { %3718 = vmatmul.mubr.msk.f32.vlgmr.msra.gmra.mrb[0].mxu0 %vm372_vm1, %v147_v28 }
  0xa2   :  { %3678 = vmatmul.mubr.msk.f32.vlgmr.msra.gmra.mrb[0].mxu1 %vm167_vm0, %v143_v29  ;;  %3720 = vmatprep.mubr.msk.f32.mxu0 %vm372_vm1, %v148_v30 }
  0xa3   :  { %3958 = vmatpush3.bf16.msra.mxu1 %v3955_v25  ;;  %3680 = vmatprep.mubr.msk.f32.mxu1 %vm167_vm0, %v144_v32 }
  0xa4   :  { %3960 = vmatprep.subr.bf16.mxu1 %v3959_v31 }
  0xa5   :  { %3721 = vmatmul.mubr.msk.f32.gmra.mrb[2].mxu0 %vm372_vm1, %v149_v35 }
  0xa6   :  { %3681 = vmatmul.mubr.msk.f32.gmra.mrb[2].mxu1 %vm167_vm0, %v145_v36  ;;  %3743 = vmatprep.mubr.msk.f32.mxu0 %vm4349_vm2, %v4348_v52 }
  0xa7   :  { %3962 = vmatpush3.bf16.msra.mxu1 %v3959_v31  ;;  %3699 = vmatprep.mubr.msk.f32.mxu1 %vm167_vm0, %v142_v10 }
  0xa8   :  { %3964 = vmatprep.subr.bf16.mxu1 %v3963_v37 }
  0xab   :  { %3966 = vmatpush3.bf16.msra.mxu1 %v3963_v37 }
  0xac   :  { %3968 = vmatprep.subr.bf16.mxu1 %v3967_v40 }
  0xaf   :  { %3970 = vmatpush3.bf16.msra.mxu1 %v3967_v40 }
  0xb0   :  { %3984 = vmatprep.subr.bf16.mxu1 %v3983_v43 }
  0xb2   :  { %3700 = vmatmul.mubr.msk.f32.vlgmr.msra.gmra.mrb[4].mxu1 %vm167_vm0, %v143_v29 }
  0xb3   :  { %3702 = vmatprep.mubr.msk.f32.mxu1 %vm167_vm0, %v144_v32  ;;  %3986 = vmatpush3.bf16.msra.mxu1 %v3983_v43 }
  0xb4   :  { %3988 = vmatprep.subr.bf16.mxu1 %v3987_v46 }
  0xb6   :  { %3703 = vmatmul.mubr.msk.f32.gmra.mrb[6].mxu1 %vm167_vm0, %v145_v36 }
  0xb7   :  { %3990 = vmatpush3.bf16.msra.mxu1 %v3987_v46  ;;  %3735 = vmatprep.mubr.msk.f32.mxu1 %vm372_vm1, %v150_v49 }
  0xb8   :  { %3992 = vmatprep.subr.bf16.mxu1 %v3991_v50 }
  0xbb   :  { %3994 = vmatpush3.bf16.msra.mxu1 %v3991_v50 }
  0xbc   :  { %3746 = vmatprep.subr.mxu1 %v4348_v52 }
  0xbe   :  { %3736 = vmatmul.mubr.msk.f32.vlgmr.msra.gmra.mrb[8].mxu1 %vm372_vm1, %v151_v51 }
  0xbf   :  { %3738 = vmatprep.mubr.msk.f32.mxu1 %vm372_vm1, %v152_v53 }
  0xc2   :  { %3739 = vmatmul.mubr.msk.f32.gmra.mrb[10].mxu1 %vm372_vm1, %v153_v54 }
  0xc3   :  { %3748 = vmatprep.mubr.msk.f32.mxu1 %vm4349_vm2, %v4348_v52 }
 0x174   :  { %v3719_v60 = vpop.f32.mrb[0].mxu0 }
 0x175   :  { %v4580_v61 = vpop.f32.mrb[0].mxu1  ;;  %v4582_v62 = vadd.f32 %v3719_v60, %v371_v59  ;;  %v451_v63 = vpop.f32.mrb[1].mxu0 }
 0x176   :  { %v4584_v0 = vpop.f32.mrb[1].mxu1  ;;  %v4586_v1 = vadd.f32 %v451_v63, %v371_v59 }
 0x177   :  { %3747 = vmatpush3.xpose.msk.msra.mxu1 %vm577_vm3, %v4582_v62 }
 0x178   :  { %3742 = vmatpush3.xpose.msk.msra.mxu0 %vm577_vm3, %v4586_v1  ;;  %v3722_v2 = vpop.f32.mrb[2].mxu0  ;;  %3756 = vmatprep.subr.mxu1 %v4348_v52 }
 0x179   :  { %v4593_v3 = vpop.f32.mrb[2].mxu1  ;;  %v461_v4 = vpop.f32.mrb[3].mxu0  ;;  %3751 = vmatprep.subr.mxu0 %v4348_v52  ;;  %v4599_v9 = vadd.f32 %v3722_v2, %v371_v59 }
 0x17a   :  { %v4596_v5 = vpop.f32.mrb[3].mxu1  ;;  %v4603_v12 = vadd.f32 %v461_v4, %v371_v59 }
 0x185   :  { %v3701_v8 = vpop.f32.mrb[4].mxu1 }
 0x186   :  { %v4601_v10 = vadd.f32 %v3701_v8, %v276_v7  ;;  %v343_v11 = vpop.f32.mrb[5].mxu1 }
 0x187   :  { %v4605_v13 = vadd.f32 %v343_v11, %v276_v7 }
 0x188   :  { %3749 = vmatmul.mubr.msk.f32.vlgmr.msra.gmra.mrb[12].mxu1 %vm577_vm3, %v4601_v10 }
 0x189   :  { %v3704_v14 = vpop.f32.mrb[6].mxu1  ;;  %3744 = vmatmul.mubr.msk.f32.vlgmr.msra.gmra.mrb[4].mxu0 %vm577_vm3, %v4605_v13  ;;  %3757 = vmatpush3.xpose.msk.msra.mxu1 %vm577_vm3, %v4599_v9 }
 0x18a   :  { %v4613_v15 = vadd.f32 %v3704_v14, %v276_v7  ;;  %v353_v16 = vpop.f32.mrb[7].mxu1  ;;  %3752 = vmatpush3.xpose.msk.msra.mxu0 %vm577_vm3, %v4603_v12  ;;  %3753 = vmatprep.mubr.msk.f32.mxu0 %vm4349_vm2, %v4348_v52 }
 0x18b   :  { %v4619_v17 = vadd.f32 %v353_v16, %v276_v7  ;;  %3758 = vmatprep.mubr.msk.f32.mxu1 %vm4349_vm2, %v4348_v52  ;;  %3761 = vmatprep.subr.mxu0 %v4348_v52 }
 0x18c   :  { %3759 = vmatmul.mubr.msk.f32.vlgmr.msra.gmra.mrb[14].mxu1 %vm577_vm3, %v4613_v15  ;;  %3766 = vmatprep.subr.mxu1 %v4348_v52 }
 0x18d   :  { %3754 = vmatmul.mubr.msk.f32.vlgmr.msra.gmra.mrb[6].mxu0 %vm577_vm3, %v4619_v17  ;;  %3768 = vmatprep.mubr.msk.f32.mxu1 %vm4349_vm2, %v4348_v52 }
 0x18e   :  { %3763 = vmatprep.mubr.msk.f32.mxu0 %vm4349_vm2, %v4348_v52 }
 0x191   :  { %v3737_v20 = vpop.f32.mrb[8].mxu1 }
 0x192   :  { %v4634_v21 = vadd.f32 %v3737_v20, %v479_v19  ;;  %v558_v22 = vpop.f32.mrb[9].mxu1 }
 0x193   :  { %v4636_v23 = vadd.f32 %v558_v22, %v479_v19 }
 0x194   :  { %3767 = vmatpush3.msra.mxu1 %v4634_v21 }
 0x195   :  { %v3740_v24 = vpop.f32.mrb[10].mxu1  ;;  %3762 = vmatpush3.msra.mxu0 %v4636_v23  ;;  %3776 = vmatprep.subr.mxu1 %v4348_v52 }
 0x196   :  { %v4641_v25 = vadd.f32 %v3740_v24, %v479_v19  ;;  %v568_v26 = vpop.f32.mrb[11].mxu1  ;;  %3771 = vmatprep.subr.mxu0 %v4348_v52 }
 0x197   :  { %v4644_v27 = vadd.f32 %v568_v26, %v479_v19 }
 0x25b   :  { %v726_v28 = vpop.f32.mrb[12].mxu1 }
 0x25c   :  { %v650_v29 = vpop.f32.mrb[4].mxu0  ;;  %v3750_v30 = vpop.f32.mrb[13].mxu1  ;;  %v886_v37 = vsel %vm882_vm4, %v726_v28, -inf }
 0x25d   :  { %v3745_v31 = vpop.f32.mrb[5].mxu0  ;;  %v883_v32 = vsel %vm882_vm4, %v650_v29, -inf }
 0x25e   :  { %884 = vmax.xlane.f32.xlu0 %v883_v32 }
 0x25f   :  { %v878_v33 = vpop.f32.mrb[14].mxu1 }
 0x260   :  { %v802_v34 = vpop.f32.mrb[6].mxu0  ;;  %v3760_v35 = vpop.f32.mrb[15].mxu1  ;;  %v892_v39 = vsel %vm882_vm4, %v878_v33, -inf }
 0x261   :  { %v3755_v36 = vpop.f32.mrb[7].mxu0  ;;  %v889_v38 = vsel %vm882_vm4, %v802_v34, -inf }
 0x262   :  { %887 = vmax.xlane.f32.xlu0 %v886_v37  ;;  %890 = vmax.xlane.f32.xlu1 %v889_v38 }
 0x266   :  { %893 = vmax.xlane.f32.xlu1 %v892_v39 }
 0x2eb   :  { %v885_v40 = vpop.xlane.xlu0 %884 }
 0x2ec   :  { %v895_v41 = vsub.f32 %v650_v29, %v885_v40 }
 0x2ee   :  { %v899_v42 = vmul.f32 1.442695, %v895_v41 }
 0x2ef   :  { %v888_v43 = vpop.xlane.xlu0 %887  ;;  %v891_v44 = vpop.xlane.xlu1 %890 }
 0x2f0   :  { %4055 = vpow2.f32 %v899_v42  ;;  %v896_v45 = vsub.f32 %v726_v28, %v888_v43  ;;  %v897_v46 = vsub.f32 %v802_v34, %v891_v44 }
 0x2f2   :  { %v901_v47 = vmul.f32 1.442695, %v896_v45  ;;  %v903_v48 = vmul.f32 1.442695, %v897_v46 }
 0x2f3   :  { %v894_v49 = vpop.xlane.xlu1 %893 }
 0x2f4   :  { %4057 = vpow2.f32 %v901_v47  ;;  %v898_v50 = vsub.f32 %v878_v33, %v894_v49 }
 0x2f5   :  { %4059 = vpow2.f32 %v903_v48 }
 0x2f6   :  { %v905_v51 = vmul.f32 1.442695, %v898_v50 }
 0x2f8   :  { %4061 = vpow2.f32 %v905_v51 }
 0x2fa   :  { %v4056_v53 = vpop.eup %4055 }
 0x2fb   :  { %v907_v54 = vsel %vm882_vm4, %v4056_v53, 0.0 }
 0x2fc   :  { %908 = vadd.xlane.f32.xlu0 %v907_v54 }
 0x2fe   :  { %v4058_v55 = vpop.eup %4057 }
 0x2ff   :  { %v4060_v57 = vpop.eup %4059  ;;  %v910_v58 = vsel %vm882_vm4, %v4058_v55, 0.0 }
 0x300   :  { %911 = vadd.xlane.f32.xlu1 %v910_v58  ;;  %v913_v59 = vsel %vm882_vm4, %v4060_v57, 0.0 }
 0x301   :  { %914 = vadd.xlane.f32.xlu0 %v913_v59 }
 0x302   :  { %v4062_v60 = vpop.eup %4061 }
 0x303   :  { %v916_v63 = vsel %vm882_vm4, %v4062_v60, 0.0 }
 0x304   :  { %917 = vadd.xlane.f32.xlu1 %v916_v63 }
 0x315   :  { %1303 = vrot.lane.b32.xlu1 %v4582_v62, %s4350_s15 }
 0x317   :  { %1225 = vrot.lane.b32.xlu0 %v4586_v1, %s4350_s15 }
 0x319   :  { %1223 = vrot.lane.b32.xlu1 %v4605_v13, %s4350_s15 }
 0x31b   :  { %1381 = vrot.lane.b32.xlu0 %v4603_v12, %s4350_s15 }
 0x31d   :  { %1301 = vrot.lane.b32.xlu1 %v4601_v10, %s4350_s15 }
 0x31f   :  { %1379 = vrot.lane.b32.xlu0 %v4619_v17, %s4350_s15 }
 0x321   :  { %1459 = vrot.lane.b32.xlu1 %v4599_v9, %s4350_s15 }
 0x325   :  { %1457 = vrot.lane.b32.xlu1 %v4613_v15, %s4350_s15 }
 0x389   :  { %v909_v2 = vpop.xlane.xlu0 %908 }
 0x38a   :  { %4063 = vrcp.f32 %v909_v2 }
 0x38d   :  { %v912_v4 = vpop.xlane.xlu1 %911 }
 0x38e   :  { %v915_v6 = vpop.xlane.xlu0 %914  ;;  %4065 = vrcp.f32 %v912_v4 }
 0x38f   :  { %4067 = vrcp.f32 %v915_v6 }
 0x391   :  { %v918_v7 = vpop.xlane.xlu1 %917 }
 0x392   :  { %4069 = vrcp.f32 %v918_v7  ;;  %v1226_v20 = vpop.permute.xlu0 %1225 }
 0x394   :  { %v4064_v8 = vpop.eup %4063 }
 0x395   :  { %v923_v11 = vmul.f32 %v4064_v8, %v4056_v53  ;;  %v1304_v14 = vpop.permute.xlu1 %1303 }
 0x396   :  { %v1382_v30 = vpop.permute.xlu0 %1381 }
 0x397   :  { %3764 = vmatmul.mubr.msk.f32.vlgmr.msra.gmra.mrb[8].mxu0 %vm882_vm4, %v923_v11 }
 0x398   :  { %v4066_v16 = vpop.eup %4065  ;;  %3772 = vmatpush3.msra.mxu0 %v4644_v27  ;;  %3773 = vmatprep.mubr.msk.f32.mxu0 %vm4349_vm2, %v4348_v52 }
 0x399   :  { %v4068_v18 = vpop.eup %4067  ;;  %v924_v19 = vmul.f32 %v4066_v16, %v4058_v55  ;;  %v1224_v22 = vpop.permute.xlu1 %1223  ;;  %3781 = vmatprep.subr.mxu0 %v4348_v52 }
 0x39a   :  { %v925_v24 = vmul.f32 %v4068_v18, %v4060_v57  ;;  %v1380_v32 = vpop.permute.xlu0 %1379 }
 0x39b   :  { %3769 = vmatmul.mubr.msk.f32.vlgmr.msra.gmra.mrb[16].mxu1 %vm882_vm4, %v924_v19 }
 0x39c   :  { %v4070_v26 = vpop.eup %4069  ;;  %3774 = vmatmul.mubr.msk.f32.vlgmr.msra.gmra.mrb[10].mxu0 %vm882_vm4, %v925_v24  ;;  %3777 = vmatpush3.msra.mxu1 %v4641_v25 }
 0x39d   :  { %v926_v28 = vmul.f32 %v4070_v26, %v4062_v60  ;;  %v1302_v29 = vpop.permute.xlu1 %1301  ;;  %3778 = vmatprep.mubr.msk.f32.mxu1 %vm4349_vm2, %v4348_v52  ;;  %3783 = vmatprep.mubr.msk.f32.mxu0 %vm4349_vm2, %v4348_v52 }
 0x39e   :  { %3786 = vmatprep.subr.mxu1 %v4348_v52 }
 0x39f   :  { %3782 = vmatpush3.xpose.msk.msra.mxu0 %vm577_vm3, %v1226_v20  ;;  %3779 = vmatmul.mubr.msk.f32.vlgmr.msra.gmra.mrb[18].mxu1 %vm882_vm4, %v926_v28 }
 0x3a0   :  { %3791 = vmatprep.subr.mxu0 %v4348_v52  ;;  %3788 = vmatprep.mubr.msk.f32.mxu1 %vm4349_vm2, %v4348_v52 }
 0x3a1   :  { %v1460_v31 = vpop.permute.xlu1 %1459 }
 0x3a2   :  { %3784 = vmatmul.mubr.msk.f32.vlgmr.msra.gmra.mrb[12].mxu0 %vm577_vm3, %v1224_v22 }
 0x3a3   :  { %3787 = vmatpush3.xpose.msk.msra.mxu1 %vm577_vm3, %v1304_v14  ;;  %3792 = vmatpush3.xpose.msk.msra.mxu0 %vm577_vm3, %v1382_v30 }
 0x3a4   :  { %3793 = vmatprep.mubr.msk.f32.mxu0 %vm4349_vm2, %v4348_v52  ;;  %3796 = vmatprep.subr.mxu1 %v4348_v52 }
 0x3a5   :  { %3801 = vmatprep.subr.mxu0 %v4348_v52  ;;  %v1458_v33 = vpop.permute.xlu1 %1457 }
 0x3a6   :  { %3789 = vmatmul.mubr.msk.f32.vlgmr.msra.gmra.mrb[20].mxu1 %vm577_vm3, %v1302_v29  ;;  %3794 = vmatmul.mubr.msk.f32.vlgmr.msra.gmra.mrb[14].mxu0 %vm577_vm3, %v1380_v32 }
 0x3a7   :  { %3797 = vmatpush3.xpose.msk.msra.mxu1 %vm577_vm3, %v1460_v31  ;;  %3798 = vmatprep.mubr.msk.f32.mxu1 %vm4349_vm2, %v4348_v52 }
 0x3a8   :  { %3806 = vmatprep.subr.mxu1 %v4348_v52  ;;  %3803 = vmatprep.mubr.msk.f32.mxu0 %vm4349_vm2, %v4348_v52 }
 0x3aa   :  { %3799 = vmatmul.mubr.msk.f32.vlgmr.msra.gmra.mrb[22].mxu1 %vm577_vm3, %v1458_v33 }
 0x3ab   :  { %3808 = vmatprep.mubr.msk.f32.mxu1 %vm4349_vm2, %v4348_v52 }
 0x46a   :  { %v996_v34 = vpop.f32.mrb[8].mxu0 }
 0x46b   :  { %1219 = vst.msk [vmem:[#allocation2] sm:$0xff] %vm577_vm3, %v996_v34  ;;  %v3765_v35 = vpop.f32.mrb[9].mxu0 }
 0x46e   :  { %v1069_v36 = vpop.f32.mrb[16].mxu1 }
 0x46f   :  { %1220 = vst.msk [vmem:[#allocation2 + $0x8] sm:$0xff] %vm577_vm3, %v1069_v36  ;;  %v1142_v37 = vpop.f32.mrb[10].mxu0  ;;  %v3770_v38 = vpop.f32.mrb[17].mxu1 }
 0x470   :  { %1221 = vst.msk [vmem:[#allocation2 + $0x10] sm:$0xff] %vm577_vm3, %v1142_v37  ;;  %v3775_v39 = vpop.f32.mrb[11].mxu0 }
 0x472   :  { %v1215_v40 = vpop.f32.mrb[18].mxu1 }
 0x473   :  { %1222 = vst.msk [vmem:[#allocation2 + $0x18] sm:$0xff] %vm577_vm3, %v1215_v40  ;;  %v3780_v41 = vpop.f32.mrb[19].mxu1 }
 0x475   :  { %v1297_v42 = vpop.f32.mrb[12].mxu0 }
 0x476   :  { %v3785_v43 = vpop.f32.mrb[13].mxu0  ;;  %v1535_v44 = vsel %vm882_vm4, %v1297_v42, -inf }
 0x477   :  { %1536 = vmax.xlane.f32.xlu0 %v1535_v44 }
 0x479   :  { %v1375_v45 = vpop.f32.mrb[20].mxu1  ;;  %v1453_v46 = vpop.f32.mrb[14].mxu0 }
 0x47a   :  { %v3790_v47 = vpop.f32.mrb[21].mxu1  ;;  %v3795_v48 = vpop.f32.mrb[15].mxu0  ;;  %v1538_v49 = vsel %vm882_vm4, %v1375_v45, -inf  ;;  %v1541_v50 = vsel %vm882_vm4, %v1453_v46, -inf }
 0x47b   :  { %1539 = vmax.xlane.f32.xlu1 %v1538_v49  ;;  %1542 = vmax.xlane.f32.xlu0 %v1541_v50 }
 0x47d   :  { %v1531_v51 = vpop.f32.mrb[22].mxu1 }
 0x47e   :  { %v3800_v53 = vpop.f32.mrb[23].mxu1  ;;  %v1544_v54 = vsel %vm882_vm4, %v1531_v51, -inf }
 0x47f   :  { %1545 = vmax.xlane.f32.xlu0 %v1544_v54 }
 0x48c   :  { %1657 = vrot.lane.b32.xlu1 %v4634_v21, %s4350_s15 }
 0x490   :  { %1734 = vrot.lane.b32.xlu1 %v4644_v27, %s4350_s15 }
 0x494   :  { %1811 = vrot.lane.b32.xlu1 %v4641_v25, %s4350_s15 }
 0x495   :  { %1580 = vrot.lane.b32.xlu0 %v4636_v23, %s4350_s15 }
 0x498   :  { %1988 = vrot.lane.b32.xlu1 %v4582_v62, %s4351_s16 }
 0x499   :  { %1910 = vrot.lane.b32.xlu0 %v4586_v1, %s4351_s16 }
 0x504   :  { %v1537_v55 = vpop.xlane.xlu0 %1536 }
 0x505   :  { %v1547_v57 = vsub.f32 %v1297_v42, %v1537_v55 }
 0x507   :  { %v1551_v58 = vmul.f32 1.442695, %v1547_v57 }
 0x508   :  { %v1540_v59 = vpop.xlane.xlu1 %1539  ;;  %v1543_v60 = vpop.xlane.xlu0 %1542 }
 0x509   :  { %4071 = vpow2.f32 %v1551_v58  ;;  %v1548_v63 = vsub.f32 %v1375_v45, %v1540_v59  ;;  %v1549_v2 = vsub.f32 %v1453_v46, %v1543_v60 }
 0x50b   :  { %v1553_v4 = vmul.f32 1.442695, %v1548_v63  ;;  %v1555_v6 = vmul.f32 1.442695, %v1549_v2 }
 0x50c   :  { %v1658_v7 = vpop.permute.xlu1 %1657  ;;  %v1546_v8 = vpop.xlane.xlu0 %1545 }
 0x50d   :  { %4073 = vpow2.f32 %v1553_v4  ;;  %v1550_v11 = vsub.f32 %v1531_v51, %v1546_v8  ;;  %3807 = vmatpush3.msra.mxu1 %v1658_v7 }
 0x50e   :  { %4075 = vpow2.f32 %v1555_v6  ;;  %3816 = vmatprep.subr.mxu1 %v4348_v52 }
 0x50f   :  { %v1557_v14 = vmul.f32 1.442695, %v1550_v11 }
 0x510   :  { %v1581_v16 = vpop.permute.xlu0 %1580  ;;  %v1735_v30 = vpop.permute.xlu1 %1734 }
 0x511   :  { %4077 = vpow2.f32 %v1557_v14  ;;  %3802 = vmatpush3.msra.mxu0 %v1581_v16 }
 0x512   :  { %3811 = vmatprep.subr.mxu0 %v4348_v52 }
 0x513   :  { %v4072_v18 = vpop.eup %4071 }
 0x514   :  { %v1559_v19 = vsel %vm882_vm4, %v4072_v18, 0.0  ;;  %v1812_v31 = vpop.permute.xlu1 %1811  ;;  %v1911_v32 = vpop.permute.xlu0 %1910 }
 0x515   :  { %1560 = vadd.xlane.f32.xlu0 %v1559_v19 }
 0x517   :  { %v4074_v20 = vpop.eup %4073 }
 0x518   :  { %v4076_v22 = vpop.eup %4075  ;;  %v1562_v24 = vsel %vm882_vm4, %v4074_v20, 0.0  ;;  %v1989_v33 = vpop.permute.xlu1 %1988 }
 0x519   :  { %1563 = vadd.xlane.f32.xlu1 %v1562_v24  ;;  %v1565_v26 = vsel %vm882_vm4, %v4076_v22, 0.0 }
 0x51a   :  { %1566 = vadd.xlane.f32.xlu0 %v1565_v26 }
 0x51b   :  { %v4078_v28 = vpop.eup %4077 }
 0x51c   :  { %v1568_v29 = vsel %vm882_vm4, %v4078_v28, 0.0 }
 0x51d   :  { %1569 = vadd.xlane.f32.xlu1 %v1568_v29 }
 0x52e   :  { %1986 = vrot.lane.b32.xlu1 %v4601_v10, %s4351_s16 }
 0x530   :  { %1908 = vrot.lane.b32.xlu0 %v4605_v13, %s4351_s16 }
 0x532   :  { %2144 = vrot.lane.b32.xlu1 %v4599_v9, %s4351_s16 }
 0x534   :  { %2066 = vrot.lane.b32.xlu0 %v4603_v12, %s4351_s16 }
 0x536   :  { %2142 = vrot.lane.b32.xlu1 %v4613_v15, %s4351_s16 }
 0x538   :  { %2064 = vrot.lane.b32.xlu0 %v4619_v17, %s4351_s16 }
 0x53a   :  { %2340 = vrot.lane.b32.xlu1 %v4634_v21, %s4351_s16 }
 0x53c   :  { %2264 = vrot.lane.b32.xlu0 %v4636_v23, %s4351_s16 }
 0x53e   :  { %2416 = vrot.lane.b32.xlu1 %v4644_v27, %s4351_s16 }
 0x542   :  { %2492 = vrot.lane.b32.xlu1 %v4641_v25, %s4351_s16 }
 0x5a2   :  { %v1561_v34 = vpop.xlane.xlu0 %1560 }
 0x5a3   :  { %4079 = vrcp.f32 %v1561_v34 }
 0x5a6   :  { %v1564_v35 = vpop.xlane.xlu1 %1563 }
 0x5a7   :  { %4081 = vrcp.f32 %v1564_v35  ;;  %v1567_v36 = vpop.xlane.xlu0 %1566 }
 0x5a8   :  { %4083 = vrcp.f32 %v1567_v36 }
 0x5aa   :  { %v1570_v37 = vpop.xlane.xlu1 %1569 }
 0x5ab   :  { %4085 = vrcp.f32 %v1570_v37  ;;  %v1909_v39 = vpop.permute.xlu0 %1908 }
 0x5ad   :  { %v4080_v38 = vpop.eup %4079 }
 0x5ae   :  { %v1575_v40 = vmul.f32 %v4080_v38, %v4072_v18  ;;  %v1987_v42 = vpop.permute.xlu1 %1986 }
 0x5af   :  { %v2067_v46 = vpop.permute.xlu0 %2066 }
 0x5b0   :  { %3804 = vmatmul.mubr.msk.f32.vlgmr.msra.gmra.mrb[16].mxu0 %vm882_vm4, %v1575_v40 }
 0x5b1   :  { %v4082_v41 = vpop.eup %4081  ;;  %3812 = vmatpush3.msra.mxu0 %v1735_v30  ;;  %3813 = vmatprep.mubr.msk.f32.mxu0 %vm4349_vm2, %v4348_v52 }
 0x5b2   :  { %v4084_v43 = vpop.eup %4083  ;;  %v1576_v44 = vmul.f32 %v4082_v41, %v4074_v20  ;;  %3821 = vmatprep.subr.mxu0 %v4348_v52  ;;  %v2145_v49 = vpop.permute.xlu1 %2144 }
 0x5b3   :  { %v1577_v45 = vmul.f32 %v4084_v43, %v4076_v22  ;;  %v2065_v50 = vpop.permute.xlu0 %2064 }
 0x5b4   :  { %3809 = vmatmul.mubr.msk.f32.vlgmr.msra.gmra.mrb[24].mxu1 %vm882_vm4, %v1576_v44 }
 0x5b5   :  { %v4086_v47 = vpop.eup %4085  ;;  %3814 = vmatmul.mubr.msk.f32.vlgmr.msra.gmra.mrb[18].mxu0 %vm882_vm4, %v1577_v45  ;;  %3817 = vmatpush3.msra.mxu1 %v1812_v31 }
 0x5b6   :  { %v1578_v48 = vmul.f32 %v4086_v47, %v4078_v28  ;;  %3818 = vmatprep.mubr.msk.f32.mxu1 %vm4349_vm2, %v4348_v52  ;;  %3823 = vmatprep.mubr.msk.f32.mxu0 %vm4349_vm2, %v4348_v52  ;;  %v2143_v51 = vpop.permute.xlu1 %2142 }
 0x5b7   :  { %3826 = vmatprep.subr.mxu1 %v4348_v52  ;;  %v2265_v53 = vpop.permute.xlu0 %2264 }
 0x5b8   :  { %3822 = vmatpush3.xpose.msk.msra.mxu0 %vm577_vm3, %v1911_v32  ;;  %3819 = vmatmul.mubr.msk.f32.vlgmr.msra.gmra.mrb[26].mxu1 %vm882_vm4, %v1578_v48 }
 0x5b9   :  { %3831 = vmatprep.subr.mxu0 %v4348_v52  ;;  %3828 = vmatprep.mubr.msk.f32.mxu1 %vm4349_vm2, %v4348_v52 }
 0x5ba   :  { %v2341_v54 = vpop.permute.xlu1 %2340 }
 0x5bb   :  { %3824 = vmatmul.mubr.msk.f32.vlgmr.msra.gmra.mrb[20].mxu0 %vm577_vm3, %v1909_v39 }
 0x5bc   :  { %3827 = vmatpush3.xpose.msk.msra.mxu1 %vm577_vm3, %v1989_v33  ;;  %3832 = vmatpush3.xpose.msk.msra.mxu0 %vm577_vm3, %v2067_v46 }
 0x5bd   :  { %3833 = vmatprep.mubr.msk.f32.mxu0 %vm4349_vm2, %v4348_v52  ;;  %3836 = vmatprep.subr.mxu1 %v4348_v52 }
 0x5be   :  { %3841 = vmatprep.subr.mxu0 %v4348_v52  ;;  %v2417_v28 = vpop.permute.xlu1 %2416 }
 0x5bf   :  { %3829 = vmatmul.mubr.msk.f32.vlgmr.msra.gmra.mrb[28].mxu1 %vm577_vm3, %v1987_v42  ;;  %3834 = vmatmul.mubr.msk.f32.vlgmr.msra.gmra.mrb[22].mxu0 %vm577_vm3, %v2065_v50 }
 0x5c0   :  { %3837 = vmatpush3.xpose.msk.msra.mxu1 %vm577_vm3, %v2145_v49  ;;  %3842 = vmatpush3.msra.mxu0 %v2265_v53 }
 0x5c1   :  { %3838 = vmatprep.mubr.msk.f32.mxu1 %vm4349_vm2, %v4348_v52  ;;  %3846 = vmatprep.subr.mxu1 %v4348_v52 }
 0x5c2   :  { %3843 = vmatprep.mubr.msk.f32.mxu0 %vm4349_vm2, %v4348_v52  ;;  %3851 = vmatprep.subr.mxu0 %v4348_v52  ;;  %v2493_v29 = vpop.permute.xlu1 %2492 }
 0x5c3   :  { %3839 = vmatmul.mubr.msk.f32.vlgmr.msra.gmra.mrb[30].mxu1 %vm577_vm3, %v2143_v51 }
 0x5c4   :  { %3847 = vmatpush3.msra.mxu1 %v2341_v54  ;;  %3848 = vmatprep.mubr.msk.f32.mxu1 %vm4349_vm2, %v4348_v52 }
 0x5c5   :  { %3856 = vmatprep.subr.mxu1 %v4348_v52 }
 0x683   :  { %v4788_v55 = vpop.f32.mrb[16].mxu0 }
 0x684   :  { %v3805_v57 = vpop.f32.mrb[17].mxu0 }
 0x687   :  { %v4790_v58 = vpop.f32.mrb[24].mxu1 }
 0x688   :  { %v4792_v59 = vpop.f32.mrb[18].mxu0  ;;  %v3810_v60 = vpop.f32.mrb[25].mxu1 }
 0x689   :  { %v3815_v63 = vpop.f32.mrb[19].mxu0 }
 0x68b   :  { %v4794_v2 = vpop.f32.mrb[26].mxu1 }
 0x68c   :  { %v3820_v4 = vpop.f32.mrb[27].mxu1 }
 0x68e   :  { %v1982_v6 = vpop.f32.mrb[20].mxu0 }
 0x68f   :  { %v3825_v7 = vpop.f32.mrb[21].mxu0  ;;  %v2220_v8 = vsel %vm882_vm4, %v1982_v6, -inf }
 0x690   :  { %2221 = vmax.xlane.f32.xlu0 %v2220_v8 }
 0x692   :  { %v2060_v11 = vpop.f32.mrb[28].mxu1  ;;  %v2138_v14 = vpop.f32.mrb[22].mxu0 }
 0x693   :  { %v3830_v16 = vpop.f32.mrb[29].mxu1  ;;  %v3835_v18 = vpop.f32.mrb[23].mxu0  ;;  %v2223_v19 = vsel %vm882_vm4, %v2060_v11, -inf  ;;  %v2226_v26 = vsel %vm882_vm4, %v2138_v14, -inf }
 0x694   :  { %2224 = vmax.xlane.f32.xlu1 %v2223_v19 }
 0x696   :  { %v2216_v20 = vpop.f32.mrb[30].mxu1 }
 0x697   :  { %v3840_v22 = vpop.f32.mrb[31].mxu1  ;;  %v2229_v24 = vsel %vm882_vm4, %v2216_v20, -inf }
 0x698   :  { %2230 = vmax.xlane.f32.xlu0 %v2229_v24 }
 0x69c   :  { %2227 = vmax.xlane.f32.xlu0 %v2226_v26 }
 0x6a5   :  { %2669 = vrot.lane.b32.xlu1 %v4582_v62, %s4352_s18 }
 0x6b2   :  { %2591 = vrot.lane.b32.xlu0 %v4586_v1, %s4352_s18 }
 0x71d   :  { %v2222_v30 = vpop.xlane.xlu0 %2221 }
 0x71e   :  { %v2232_v31 = vsub.f32 %v1982_v6, %v2222_v30 }
 0x720   :  { %v2236_v32 = vmul.f32 1.442695, %v2232_v31 }
 0x721   :  { %v2225_v33 = vpop.xlane.xlu1 %2224 }
 0x722   :  { %4087 = vpow2.f32 %v2236_v32  ;;  %v2233_v34 = vsub.f32 %v2060_v11, %v2225_v33 }
 0x724   :  { %v2238_v35 = vmul.f32 1.442695, %v2233_v34 }
 0x725   :  { %v2231_v1 = vpop.xlane.xlu0 %2230 }
 0x726   :  { %4089 = vpow2.f32 %v2238_v35  ;;  %v2235_v41 = vsub.f32 %v2216_v20, %v2231_v1 }
 0x728   :  { %v2242_v43 = vmul.f32 1.442695, %v2235_v41 }
 0x729   :  { %v2228_v39 = vpop.xlane.xlu0 %2227 }
 0x72a   :  { %v2234_v40 = vsub.f32 %v2138_v14, %v2228_v39 }
 0x72c   :  { %v4088_v36 = vpop.eup %4087  ;;  %v2240_v42 = vmul.f32 1.442695, %v2234_v40 }
 0x72d   :  { %v2244_v37 = vsel %vm882_vm4, %v4088_v36, 0.0 }
 0x72e   :  { %2245 = vadd.xlane.f32.xlu0 %v2244_v37  ;;  %4091 = vpow2.f32 %v2240_v42 }
 0x72f   :  { %4093 = vpow2.f32 %v2242_v43 }
 0x730   :  { %v4090_v38 = vpop.eup %4089 }
 0x731   :  { %v2247_v62 = vsel %vm882_vm4, %v4090_v38, 0.0 }
 0x732   :  { %2248 = vadd.xlane.f32.xlu1 %v2247_v62 }
 0x738   :  { %v4092_v44 = vpop.eup %4091 }
 0x739   :  { %v2250_v45 = vsel %vm882_vm4, %v4092_v44, 0.0  ;;  %v4094_v46 = vpop.eup %4093 }
 0x73a   :  { %v2253_v47 = vsel %vm882_vm4, %v4094_v46, 0.0 }
 0x743   :  { %2667 = vrot.lane.b32.xlu1 %v4601_v10, %s4352_s18  ;;  %v2592_v10 = vpop.permute.xlu0 %2591 }
 0x744   :  { %2589 = vrot.lane.b32.xlu0 %v4605_v13, %s4352_s18  ;;  %v2670_v13 = vpop.permute.xlu1 %2669 }
 0x763   :  { %2251 = vadd.xlane.f32.xlu0 %v2250_v45 }
 0x767   :  { %2254 = vadd.xlane.f32.xlu1 %v2253_v47 }
 0x778   :  { %2825 = vrot.lane.b32.xlu1 %v4599_v9, %s4352_s18 }
 0x779   :  { %2747 = vrot.lane.b32.xlu0 %v4603_v12, %s4352_s18 }
 0x77c   :  { %2823 = vrot.lane.b32.xlu1 %v4613_v15, %s4352_s18 }
 0x77d   :  { %2745 = vrot.lane.b32.xlu0 %v4619_v17, %s4352_s18 }
 0x7bb   :  { %v2246_v48 = vpop.xlane.xlu0 %2245 }
 0x7bc   :  { %4095 = vrcp.f32 %v2246_v48 }
 0x7bf   :  { %v2249_v49 = vpop.xlane.xlu1 %2248  ;;  %v2590_v15 = vpop.permute.xlu0 %2589 }
 0x7c0   :  { %4097 = vrcp.f32 %v2249_v49 }
 0x7c3   :  { %v2668_v17 = vpop.permute.xlu1 %2667 }
 0x7c6   :  { %v4096_v50 = vpop.eup %4095 }
 0x7c7   :  { %v2260_v51 = vmul.f32 %v4096_v50, %v4088_v36 }
 0x7c9   :  { %3844 = vmatmul.mubr.msk.f32.vlgmr.msra.gmra.mrb[24].mxu0 %vm882_vm4, %v2260_v51 }
 0x7ca   :  { %v4098_v9 = vpop.eup %4097  ;;  %3852 = vmatpush3.msra.mxu0 %v2417_v28  ;;  %3853 = vmatprep.mubr.msk.f32.mxu0 %vm4349_vm2, %v4348_v52 }
 0x7cb   :  { %v2261_v12 = vmul.f32 %v4098_v9, %v4090_v38  ;;  %3861 = vmatprep.subr.mxu0 %v4348_v52 }
 0x7cd   :  { %3849 = vmatmul.mubr.msk.f32.vlgmr.msra.gmra.mrb[32].mxu1 %vm882_vm4, %v2261_v12 }
 0x7ce   :  { %3857 = vmatpush3.msra.mxu1 %v2493_v29  ;;  %3858 = vmatprep.mubr.msk.f32.mxu1 %vm4349_vm2, %v4348_v52 }
 0x7cf   :  { %3866 = vmatprep.subr.mxu1 %v4348_v52 }
 0x7f0   :  { %v2252_v53 = vpop.xlane.xlu0 %2251 }
 0x7f1   :  { %4099 = vrcp.f32 %v2252_v53 }
 0x7f4   :  { %v2255_v54 = vpop.xlane.xlu1 %2254  ;;  %v2748_v4 = vpop.permute.xlu0 %2747 }
 0x7f5   :  { %4101 = vrcp.f32 %v2255_v54 }
 0x7f8   :  { %v2826_v7 = vpop.permute.xlu1 %2825  ;;  %v2746_v8 = vpop.permute.xlu0 %2745 }
 0x7fb   :  { %v4100_v57 = vpop.eup %4099 }
 0x7fc   :  { %v2262_v60 = vmul.f32 %v4100_v57, %v4092_v44  ;;  %v2824_v11 = vpop.permute.xlu1 %2823 }
 0x7fe   :  { %3854 = vmatmul.mubr.msk.f32.vlgmr.msra.gmra.mrb[26].mxu0 %vm882_vm4, %v2262_v60 }
 0x7ff   :  { %v4102_v63 = vpop.eup %4101  ;;  %3862 = vmatpush3.xpose.msk.msra.mxu0 %vm577_vm3, %v2592_v10  ;;  %3863 = vmatprep.mubr.msk.f32.mxu0 %vm4349_vm2, %v4348_v52 }
 0x800   :  { %v2263_v6 = vmul.f32 %v4102_v63, %v4094_v46  ;;  %3871 = vmatprep.subr.mxu0 %v4348_v52 }
 0x802   :  { %3859 = vmatmul.mubr.msk.f32.vlgmr.msra.gmra.mrb[34].mxu1 %vm882_vm4, %v2263_v6  ;;  %3864 = vmatmul.mubr.msk.f32.vlgmr.msra.gmra.mrb[28].mxu0 %vm577_vm3, %v2590_v15 }
 0x803   :  { %3867 = vmatpush3.xpose.msk.msra.mxu1 %vm577_vm3, %v2670_v13  ;;  %3872 = vmatpush3.xpose.msk.msra.mxu0 %vm577_vm3, %v2748_v4 }
 0x804   :  { %3868 = vmatprep.mubr.msk.f32.mxu1 %vm4349_vm2, %v4348_v52  ;;  %3873 = vmatprep.mubr.msk.f32.mxu0 %vm4349_vm2, %v4348_v52 }
 0x805   :  { %3876 = vmatprep.subr.mxu1 %v4348_v52  ;;  %3881 = vmatprep.subr.mxu0 %v4348_v52 }
 0x806   :  { %3869 = vmatmul.mubr.msk.f32.vlgmr.msra.gmra.mrb[36].mxu1 %vm577_vm3, %v2668_v17  ;;  %3874 = vmatmul.mubr.msk.f32.vlgmr.msra.gmra.mrb[30].mxu0 %vm577_vm3, %v2746_v8 }
 0x807   :  { %3877 = vmatpush3.xpose.msk.msra.mxu1 %vm577_vm3, %v2826_v7  ;;  %3878 = vmatprep.mubr.msk.f32.mxu1 %vm4349_vm2, %v4348_v52 }
 0x808   :  { %3886 = vmatprep.subr.mxu1 %v4348_v52  ;;  %3883 = vmatprep.mubr.msk.f32.mxu0 %vm4349_vm2, %v4348_v52 }
 0x80a   :  { %3879 = vmatmul.mubr.msk.f32.vlgmr.msra.gmra.mrb[38].mxu1 %vm577_vm3, %v2824_v11 }
 0x80b   :  { %3888 = vmatprep.mubr.msk.f32.mxu1 %vm4349_vm2, %v4348_v52 }
 0x89c   :  { %v2336_v14 = vpop.f32.mrb[24].mxu0 }
 0x89d   :  { %v3845_v16 = vpop.f32.mrb[25].mxu0 }
 0x8a0   :  { %v2412_v18 = vpop.f32.mrb[32].mxu1 }
 0x8a1   :  { %v3850_v19 = vpop.f32.mrb[33].mxu1 }
 0x8d1   :  { %v2488_v20 = vpop.f32.mrb[26].mxu0 }
 0x8d2   :  { %v3855_v22 = vpop.f32.mrb[27].mxu0 }
 0x8d3   :  { %v3274_v22 = vld [vmem:[#allocation15] sm:$0xff] }
 0x8d5   :  { %v2564_v24 = vpop.f32.mrb[34].mxu1  ;;  %v2663_v26 = vpop.f32.mrb[28].mxu0 }
 0x8d6   :  { %v3860_v28 = vpop.f32.mrb[35].mxu1  ;;  %v3865_v29 = vpop.f32.mrb[29].mxu0  ;;  %v2901_v30 = vsel %vm882_vm4, %v2663_v26, -inf }
 0x8d7   :  { %2902 = vmax.xlane.f32.xlu0 %v2901_v30  ;;  %v3277_v29 = vld [vmem:[#allocation15 + $0x18] sm:$0xff] }
 0x8d9   :  { %v2741_v31 = vpop.f32.mrb[36].mxu1  ;;  %v2819_v32 = vpop.f32.mrb[30].mxu0 }
 0x8da   :  { %v3870_v33 = vpop.f32.mrb[37].mxu1  ;;  %v3875_v34 = vpop.f32.mrb[31].mxu0  ;;  %v2904_v35 = vsel %vm882_vm4, %v2741_v31, -inf  ;;  %v2907_v36 = vsel %vm882_vm4, %v2819_v32, -inf }
 0x8db   :  { %2905 = vmax.xlane.f32.xlu1 %v2904_v35  ;;  %2908 = vmax.xlane.f32.xlu0 %v2907_v36  ;;  %v3280_v34 = vld [vmem:[#allocation15 + $0x30] sm:$0xff]  ;;  %v3281_v35 = vld [vmem:[#allocation15 + $0x38] sm:$0xff] }
 0x8dc   :  { %v4007_v36 = vpack.c.bf16 %v3281_v35, %v3280_v34 }
 0x8dd   :  { %v2897_v37 = vpop.f32.mrb[38].mxu1 }
 0x8de   :  { %v3880_v38 = vpop.f32.mrb[39].mxu1  ;;  %v2910_v62 = vsel %vm882_vm4, %v2897_v37, -inf }
 0x8df   :  { %2911 = vmax.xlane.f32.xlu0 %v2910_v62  ;;  %v3283_v38 = vld [vmem:[#allocation15 + $0x48] sm:$0xff] }
 0x964   :  { %v2903_v1 = vpop.xlane.xlu0 %2902 }
 0x965   :  { %v2913_v39 = vsub.f32 %v2663_v26, %v2903_v1  ;;  %v3276_v26 = vld [vmem:[#allocation15 + $0x10] sm:$0xff] }
 0x966   :  { %v3999_v30 = vpack.c.bf16 %v3277_v29, %v3276_v26  ;;  %v3284_v1 = vld [vmem:[#allocation15 + $0x50] sm:$0xff] }
 0x967   :  { %v2917_v40 = vmul.f32 1.442695, %v2913_v39  ;;  %v3285_v39 = vld [vmem:[#allocation15 + $0x58] sm:$0xff] }
 0x968   :  { %v2906_v41 = vpop.xlane.xlu1 %2905  ;;  %v2909_v42 = vpop.xlane.xlu0 %2908 }
 0x969   :  { %4103 = vpow2.f32 %v2917_v40  ;;  %v2914_v43 = vsub.f32 %v2741_v31, %v2906_v41  ;;  %v2915_v44 = vsub.f32 %v2819_v32, %v2909_v42  ;;  %v3278_v31 = vld [vmem:[#allocation15 + $0x20] sm:$0xff]  ;;  %v3279_v32 = vld [vmem:[#allocation15 + $0x28] sm:$0xff]  ;;  %v4015_v40 = vpack.c.bf16 %v3285_v39, %v3284_v1 }
 0x96a   :  { %v4003_v33 = vpack.c.bf16 %v3279_v32, %v3278_v31  ;;  %v3286_v41 = vld [vmem:[#allocation15 + $0x60] sm:$0xff]  ;;  %v3287_v42 = vld [vmem:[#allocation15 + $0x68] sm:$0xff] }
 0x96b   :  { %v2919_v45 = vmul.f32 1.442695, %v2914_v43  ;;  %v2921_v46 = vmul.f32 1.442695, %v2915_v44  ;;  %v4019_v43 = vpack.c.bf16 %v3287_v42, %v3286_v41  ;;  %v3288_v44 = vld [vmem:[#allocation15 + $0x70] sm:$0xff] }
 0x96c   :  { %v2912_v47 = vpop.xlane.xlu0 %2911 }
 0x96d   :  { %4105 = vpow2.f32 %v2919_v45  ;;  %v2916_v10 = vsub.f32 %v2897_v37, %v2912_v47  ;;  %v3282_v37 = vld [vmem:[#allocation15 + $0x40] sm:$0xff]  ;;  %v3289_v45 = vld [vmem:[#allocation15 + $0x78] sm:$0xff] }
 0x96e   :  { %4107 = vpow2.f32 %v2921_v46  ;;  %v4011_v62 = vpack.c.bf16 %v3283_v38, %v3282_v37  ;;  %v4023_v46 = vpack.c.bf16 %v3289_v45, %v3288_v44 }
 0x96f   :  { %v2923_v13 = vmul.f32 1.442695, %v2916_v10 }
 0x971   :  { %4109 = vpow2.f32 %v2923_v13 }
 0x973   :  { %v4104_v48 = vpop.eup %4103 }
 0x974   :  { %v2925_v49 = vsel %vm882_vm4, %v4104_v48, 0.0 }
 0x975   :  { %2926 = vadd.xlane.f32.xlu0 %v2925_v49 }
 0x977   :  { %v4106_v50 = vpop.eup %4105 }
 0x978   :  { %v4108_v51 = vpop.eup %4107  ;;  %v2928_v9 = vsel %vm882_vm4, %v4106_v50, 0.0 }
 0x979   :  { %2929 = vadd.xlane.f32.xlu1 %v2928_v9  ;;  %v2931_v12 = vsel %vm882_vm4, %v4108_v51, 0.0 }
 0x97a   :  { %2932 = vadd.xlane.f32.xlu0 %v2931_v12 }
 0x97b   :  { %v4110_v15 = vpop.eup %4109 }
 0x97c   :  { %v2934_v17 = vsel %vm882_vm4, %v4110_v15, 0.0 }
 0x97d   :  { %2935 = vadd.xlane.f32.xlu1 %v2934_v17 }
 0x98e   :  { %3021 = vrot.lane.b32.xlu1 %v4634_v21, %s4352_s18 }
 0x990   :  { %2945 = vrot.lane.b32.xlu0 %v4636_v23, %s4352_s18 }
 0x992   :  { %3097 = vrot.lane.b32.xlu1 %v4644_v27, %s4352_s18 }
 0x994   :  { %1891 = vrot.lane.b32.xlu0 %v4788_v55, %s4352_s18 }
 0x996   :  { %3173 = vrot.lane.b32.xlu1 %v4641_v25, %s4352_s18 }
 0x998   :  { %2572 = vrot.lane.b32.xlu0 %v2336_v14, %s4351_s16 }
 0x99a   :  { %1893 = vrot.lane.b32.xlu1 %v4790_v58, %s4352_s18 }
 0x99c   :  { %1895 = vrot.lane.b32.xlu0 %v4792_v59, %s4352_s18 }
 0x99e   :  { %2574 = vrot.lane.b32.xlu1 %v2412_v18, %s4351_s16 }
 0x9a0   :  { %2576 = vrot.lane.b32.xlu0 %v2488_v20, %s4351_s16 }
 0x9a2   :  { %1897 = vrot.lane.b32.xlu1 %v4794_v2, %s4352_s18 }
 0x9a6   :  { %2578 = vrot.lane.b32.xlu1 %v2564_v24, %s4351_s16  ;;  %v3275_v24 = vld [vmem:[#allocation15 + $0x8] sm:$0xff] }
 0x9a7   :  { %v3995_v28 = vpack.c.bf16 %v3275_v24, %v3274_v22 }
 0xa02   :  { %v2927_v21 = vpop.xlane.xlu0 %2926 }
 0xa03   :  { %4111 = vrcp.f32 %v2927_v21 }
 0xa06   :  { %v2930_v23 = vpop.xlane.xlu1 %2929 }
 0xa07   :  { %4113 = vrcp.f32 %v2930_v23  ;;  %v2933_v25 = vpop.xlane.xlu0 %2932 }
 0xa08   :  { %4115 = vrcp.f32 %v2933_v25 }
 0xa0a   :  { %v2936_v27 = vpop.xlane.xlu1 %2935 }
 0xa0b   :  { %4117 = vrcp.f32 %v2936_v27  ;;  %v2946_v55 = vpop.permute.xlu0 %2945 }
 0xa0c   :  { %3882 = vmatpush3.msra.mxu0 %v2946_v55 }
 0xa0d   :  { %v4112_v58 = vpop.eup %4111  ;;  %3891 = vmatprep.subr.mxu0 %v4348_v52 }
 0xa0e   :  { %v2941_v59 = vmul.f32 %v4112_v58, %v4104_v48  ;;  %v3022_v53 = vpop.permute.xlu1 %3021  ;;  %v165_v58 = vsub.s32 0, %v4574_v56 }
 0xa0f   :  { %v1892_v54 = vpop.permute.xlu0 %1891  ;;  %3887 = vmatpush3.msra.mxu1 %v3022_v53 }
 0xa10   :  { %1904 = vst.msk [vmem:[#allocation2] sm:$0xff] %vm1903_vm5, %v1892_v54  ;;  %3884 = vmatmul.mubr.msk.f32.vlgmr.msra.gmra.mrb[32].mxu0 %vm882_vm4, %v2941_v59  ;;  %3896 = vmatprep.subr.mxu1 %v4348_v52  ;;  %v4908_v59 = vld [vmem:[%s4944_s8] sm:$0xff]  ;;  %v3292_v54 = vsub.s32 4, %v4574_v56  ;;  %s4353_s8 = smov [#allocation17]  }
 0xa11   :  { %v4114_v2 = vpop.eup %4113  ;;  %3893 = vmatprep.mubr.msk.f32.mxu0 %vm4349_vm2, %v4348_v52  ;;  %v166_v53 = vrot.slane %v4908_v59, %v165_v58  ;;  %s3453_s24 = sshll.u32 %s4353_s8, 4  ;;  %s3454_s24 = int_to_ptr.vmem [resolvable:$true] %s3453_s24 }
 0xa12   :  { %v4116_v57 = vpop.eup %4115  ;;  %v2942_v60 = vmul.f32 %v4114_v2, %v4106_v50  ;;  %v3098_v63 = vpop.permute.xlu1 %3097  ;;  %s4304_s25 = scalar_lea.vmem %s3454_s24, 512  ;;  %p4309_p9 = scmp.lt.s32.totalorder %s3454_s24, %s3454_s24 }
 0xa13   :  { %v2943_v4 = vmul.f32 %v4116_v57, %v4108_v51  ;;  %v2573_v6 = vpop.permute.xlu0 %2572  ;;  %3892 = vmatpush3.msra.mxu0 %v3098_v63  ;;  %v252_v2 = vadd.f32 %v4580_v61, %v166_v53  ;;  %v3293_v57 = vrot.slane %v4908_v59, %v3292_v54  ;;  %v262_v63 = vadd.f32 %v4593_v3, %v166_v53  ;;  %p4305_p8 = scmp.ne.s32.totalorder %s3454_s24, %s4304_s25  ;;  %p4310_p10 = scmp.lt.s32.totalorder %s4304_s25, %s4304_s25 }
 0xa14   :  { %2585 = vst.msk [vmem:[#allocation2] sm:$0xff] %vm2584_vm6, %v2573_v6  ;;  %3889 = vmatmul.mubr.msk.f32.vlgmr.msra.gmra.mrb[40].mxu1 %vm882_vm4, %v2942_v60  ;;  %3996 = vmatprep.subr.bf16.mxu0 %v3995_v28  ;;  %v247_v60 = vadd.f32 %v4584_v0, %v166_v53  ;;  %v257_v6 = vadd.f32 %v4596_v5, %v166_v53 }
 0xa15   :  { %v4118_v7 = vpop.eup %4117  ;;  %3894 = vmatmul.mubr.msk.f32.vlgmr.msra.gmra.mrb[34].mxu0 %vm882_vm4, %v2943_v4  ;;  %3898 = vmatprep.mubr.msk.f32.mxu1 %vm4349_vm2, %v4348_v52  ;;  %v4028_v4 = vadd.f32 %v3293_v57, %v252_v2  ;;  %p4311_p11 = por %p4310_p10, %p4309_p9 }
 0xa16   :  { %v2944_v8 = vmul.f32 %v4118_v7, %v4110_v15  ;;  %v3174_v11 = vpop.permute.xlu1 %3173  ;;  %3998 = vmatpush3.bf16.msra.mxu0 %v3995_v28 }
 0xa17   :  { %v1896_v14 = vpop.permute.xlu0 %1895  ;;  %3897 = vmatpush3.msra.mxu1 %v3174_v11  ;;  %4000 = vmatprep.subr.bf16.mxu0 %v3999_v30  ;;  %p4312_p12 = pnand %p4311_p11, %p4305_p8 }
 0xa18   :  { %1906 = vst.msk [vmem:[#allocation2 + $0x10] sm:$0xff] %vm1903_vm5, %v1896_v14  ;;  %3899 = vmatmul.mubr.msk.f32.vlgmr.msra.gmra.mrb[42].mxu1 %vm882_vm4, %v2944_v8  ;;  %v4031_v8 = vadd.f32 %v3293_v57, %v247_v60 }
 0xa1a   :  { %v1894_v16 = vpop.permute.xlu1 %1893  ;;  %4002 = vmatpush3.bf16.msra.mxu0 %v3999_v30 }
 0xa1b   :  { %1905 = vst.msk [vmem:[#allocation2 + $0x8] sm:$0xff] %vm1903_vm5, %v1894_v16  ;;  %v2577_v18 = vpop.permute.xlu0 %2576  ;;  %4004 = vmatprep.subr.bf16.mxu0 %v4003_v33 }
 0xa1c   :  { %2587 = vst.msk [vmem:[#allocation2 + $0x10] sm:$0xff] %vm2584_vm6, %v2577_v18  ;;  %v4034_v18 = vadd.f32 %v3293_v57, %v262_v63 }
 0xa1e   :  { %v2575_v19 = vpop.permute.xlu1 %2574  ;;  %4006 = vmatpush3.bf16.msra.mxu0 %v4003_v33 }
 0xa1f   :  { %2586 = vst.msk [vmem:[#allocation2 + $0x8] sm:$0xff] %vm2584_vm6, %v2575_v19  ;;  %4008 = vmatprep.subr.bf16.mxu0 %v4007_v36 }
 0xa22   :  { %v1898_v20 = vpop.permute.xlu1 %1897  ;;  %4010 = vmatpush3.bf16.msra.mxu0 %v4007_v36 }
 0xa23   :  { %1907 = vst.msk [vmem:[#allocation2 + $0x18] sm:$0xff] %vm1903_vm5, %v1898_v20  ;;  %4012 = vmatprep.subr.bf16.mxu0 %v4011_v62  ;;  %v4037_v20 = vadd.f32 %v3293_v57, %v257_v6 }
 0xa26   :  { %v2579_v52 = vpop.permute.xlu1 %2578  ;;  %4014 = vmatpush3.bf16.msra.mxu0 %v4011_v62 }
 0xa27   :  { %2588 = vst.msk [vmem:[#allocation2 + $0x18] sm:$0xff] %vm2584_vm6, %v2579_v52  ;;  %4016 = vmatprep.subr.bf16.mxu0 %v4015_v40 }
 0xa2a   :  { %4018 = vmatpush3.bf16.msra.mxu0 %v4015_v40 }
 0xa2b   :  { %4020 = vmatprep.subr.bf16.mxu0 %v4019_v43 }
 0xa2e   :  { %4022 = vmatpush3.bf16.msra.mxu0 %v4019_v43 }
 0xa2f   :  { %4024 = vmatprep.subr.bf16.mxu0 %v4023_v46 }
 0xa32   :  { %4026 = vmatpush3.bf16.msra.mxu0 %v4023_v46 }
 0xae3   :  { %v3017_v47 = vpop.f32.mrb[32].mxu0 }
 0xae4   :  { %3253 = vrot.lane.b32.xlu0 %v3017_v47, %s4350_s15  ;;  %v3885_v10 = vpop.f32.mrb[33].mxu0 }
 0xae5   :  { %v3430_v10 = vsub.s32 5, %v4574_v56 }
 0xae7   :  { %v3093_v13 = vpop.f32.mrb[40].mxu1 }
 0xae8   :  { %v3169_v48 = vpop.f32.mrb[34].mxu0  ;;  %3255 = vrot.lane.b32.xlu1 %v3093_v13, %s4350_s15  ;;  %v3890_v49 = vpop.f32.mrb[41].mxu1 }
 0xae9   :  { %3257 = vrot.lane.b32.xlu0 %v3169_v48, %s4350_s15  ;;  %v3895_v50 = vpop.f32.mrb[35].mxu0  ;;  %v3438_v48 = vsub.s32 6, %v4574_v56  ;;  %v3431_v49 = vrot.slane %v4908_v59, %v3430_v10 }
 0xaeb   :  { %v3245_v51 = vpop.f32.mrb[42].mxu1 }
 0xaec   :  { %3259 = vrot.lane.b32.xlu1 %v3245_v51, %s4350_s15  ;;  %v3900_v9 = vpop.f32.mrb[43].mxu1 }
 0xb56   :  { %v3254_v12 = vpop.permute.xlu0 %3253 }
 0xb57   :  { %3266 = vst.msk [vmem:[#allocation2] sm:$0xff] %vm3265_vm7, %v3254_v12  ;;  %v3439_v12 = vrot.slane %v4908_v59, %v3438_v48 }
 0xb5a   :  { %v3256_v15 = vpop.permute.xlu1 %3255 }
 0xb5b   :  { %3267 = vst.msk [vmem:[#allocation2 + $0x8] sm:$0xff] %vm3265_vm7, %v3256_v15  ;;  %v3258_v17 = vpop.permute.xlu0 %3257 }
 0xb5c   :  { %3268 = vst.msk [vmem:[#allocation2 + $0x10] sm:$0xff] %vm3265_vm7, %v3258_v17 }
 0xb5e   :  { %v3260_v21 = vpop.permute.xlu1 %3259  ;;  %v3270_v23 = vld [vmem:[#allocation2] sm:$0xff] }
 0xb5f   :  { %3269 = vst.msk [vmem:[#allocation2 + $0x18] sm:$0xff] %vm3265_vm7, %v3260_v21  ;;  %3933 = vmatprep.mubr.f32.mxu0 %v3270_v23 }
 0xb62   :  { %v3271_v25 = vld [vmem:[#allocation2 + $0x8] sm:$0xff] }
 0xb63   :  { %3934 = vmatmul.mubr.f32.vlgmr.msra.gmra.mrb[36].mxu0 %v3271_v25  ;;  %v3272_v27 = vld [vmem:[#allocation2 + $0x10] sm:$0xff] }
 0xb64   :  { %3936 = vmatprep.mubr.f32.mxu0 %v3272_v27 }
 0xb66   :  { %v3273_v55 = vld [vmem:[#allocation2 + $0x18] sm:$0xff] }
 0xb67   :  { %3937 = vmatmul.mubr.f32.gmra.mrb[38].mxu0 %v3273_v55 }
 0xc36   :  { %v3935_v7 = vpop.f32.mrb[36].mxu0 }
 0xc37   :  { %v4029_v11 = vadd.f32 %v4028_v4, %v3935_v7  ;;  %v3360_v14 = vpop.f32.mrb[37].mxu0 }
 0xc38   :  { %v4032_v16 = vadd.f32 %v4031_v8, %v3360_v14 }
 0xc39   :  { %3385 = vadd.xlane.f32.xlu1 %v4029_v11 }
 0xc3a   :  { %v3938_v19 = vpop.f32.mrb[38].mxu0  ;;  %3383 = vadd.xlane.f32.xlu0 %v4032_v16 }
 0xc3b   :  { %v4035_v61 = vadd.f32 %v4034_v18, %v3938_v19  ;;  %v3370_v52 = vpop.f32.mrb[39].mxu0 }
 0xc3c   :  { %v4038_v22 = vadd.f32 %v4037_v20, %v3370_v52 }
 0xc3e   :  { %3387 = vadd.xlane.f32.xlu0 %v4038_v22 }
 0xc42   :  { %3389 = vadd.xlane.f32.xlu0 %v4035_v61 }
 0xcc6   :  { %v3386_v0 = vpop.xlane.xlu1 %3385 }
 0xcc7   :  { %v3393_v3 = vmul.f32 0.0078125, %v3386_v0  ;;  %v3384_v24 = vpop.xlane.xlu0 %3383 }
 0xcc8   :  { %v3392_v26 = vmul.f32 0.0078125, %v3384_v24 }
 0xcc9   :  { %v3397_v5 = vsub.f32 %v4029_v11, %v3393_v3 }
 0xcca   :  { %v3396_v28 = vsub.f32 %v4032_v16, %v3392_v26 }
 0xccb   :  { %v3388_v29 = vpop.xlane.xlu0 %3387  ;;  %v3401_v30 = vmul.f32 %v3397_v5, %v3397_v5 }
 0xccc   :  { %v3394_v31 = vmul.f32 0.0078125, %v3388_v29  ;;  %v3400_v32 = vmul.f32 %v3396_v28, %v3396_v28 }
 0xccd   :  { %3406 = vadd.xlane.f32.xlu1 %v3401_v30 }
 0xcce   :  { %v3398_v33 = vsub.f32 %v4038_v22, %v3394_v31  ;;  %3404 = vadd.xlane.f32.xlu0 %v3400_v32 }
 0xccf   :  { %v3390_v34 = vpop.xlane.xlu0 %3389 }
 0xcd0   :  { %v3395_v35 = vmul.f32 0.0078125, %v3390_v34  ;;  %v3402_v36 = vmul.f32 %v3398_v33, %v3398_v33 }
 0xcd2   :  { %v3399_v37 = vsub.f32 %v4035_v61, %v3395_v35  ;;  %3408 = vadd.xlane.f32.xlu0 %v3402_v36 }
 0xcd4   :  { %v3403_v38 = vmul.f32 %v3399_v37, %v3399_v37 }
 0xcd6   :  { %3410 = vadd.xlane.f32.xlu1 %v3403_v38 }
 0xd5a   :  { %v3407_v62 = vpop.xlane.xlu1 %3406 }
 0xd5b   :  { %v3413_v1 = vmul.f32 0.0078125, %v3407_v62  ;;  %v3405_v39 = vpop.xlane.xlu0 %3404 }
 0xd5c   :  { %v3412_v40 = vmul.f32 0.0078125, %v3405_v39 }
 0xd5d   :  { %v3417_v41 = vadd.f32 1e-05, %v3413_v1 }
 0xd5e   :  { %v3416_v42 = vadd.f32 1e-05, %v3412_v40 }
 0xd5f   :  { %4119 = vrsqrt.f32 %v3417_v41  ;;  %v3409_v43 = vpop.xlane.xlu0 %3408 }
 0xd60   :  { %4121 = vrsqrt.f32 %v3416_v42  ;;  %v3414_v44 = vmul.f32 0.0078125, %v3409_v43 }
 0xd62   :  { %v3418_v45 = vadd.f32 1e-05, %v3414_v44 }
 0xd63   :  { %v3411_v46 = vpop.xlane.xlu1 %3410 }
 0xd64   :  { %4123 = vrsqrt.f32 %v3418_v45  ;;  %v3415_v47 = vmul.f32 0.0078125, %v3411_v46 }
 0xd66   :  { %v3419_v13 = vadd.f32 1e-05, %v3415_v47 }
 0xd68   :  { %4125 = vrsqrt.f32 %v3419_v13 }
 0xd69   :  { %v4120_v50 = vpop.eup %4119 }
 0xd6a   :  { %v4122_v51 = vpop.eup %4121  ;;  %v3425_v9 = vmul.f32 %v4120_v50, %v3397_v5 }
 0xd6b   :  { %v3424_v15 = vmul.f32 %v4122_v51, %v3396_v28 }
 0xd6c   :  { %v3433_v17 = vmul.f32 %v3431_v49, %v3425_v9 }
 0xd6d   :  { %v3432_v21 = vmul.f32 %v3431_v49, %v3424_v15 }
 0xd6e   :  { %v4124_v23 = vpop.eup %4123  ;;  %v3441_v25 = vadd.f32 %v3439_v12, %v3433_v17 }
 0xd6f   :  { %v3426_v27 = vmul.f32 %v4124_v23, %v3398_v33  ;;  %v3440_v55 = vadd.f32 %v3439_v12, %v3432_v21 }
 0xd70   :  { %3445 = vst [vmem:[#allocation17 + $0x8] sm:$0xff] %v3441_v25 }
 0xd71   :  { %v3434_v58 = vmul.f32 %v3431_v49, %v3426_v27  ;;  %3444 = vst [vmem:[#allocation17] sm:$0xff] %v3440_v55 }
 0xd72   :  { %v4126_v53 = vpop.eup %4125 }
 0xd73   :  { %v3427_v56 = vmul.f32 %v4126_v53, %v3399_v37  ;;  %v3442_v54 = vadd.f32 %v3439_v12, %v3434_v58 }
 0xd75   :  { %v3435_v2 = vmul.f32 %v3431_v49, %v3427_v56  ;;  %3446 = vst [vmem:[#allocation17 + $0x10] sm:$0xff] %v3442_v54 }
 0xd77   :  { %v3443_v57 = vadd.f32 %v3439_v12, %v3435_v2 }
 0xd79   :  { %3447 = vst [vmem:[#allocation17 + $0x18] sm:$0xff] %v3443_v57 }
 0xd7a   :  { %4315 = shalt.err (!%p4312_p12)
}
 0xd7b   :  { %s4316_s12 = scalar_lea.hbm %s4945_s9, 512 }
 0xd7c   :  { %p4317_p13 = scmp.ne.s32.totalorder %s4945_s9, %s4316_s12  ;;  %p4320_p0 = scmp.lt.u32.totalorder %s4316_s12, %s4945_s9 }
 0xd7e   :  { %p4322_p1 = pnand %p4320_p0, %p4317_p13 }
 0xd80   :  { %4325 = shalt.err (!%p4322_p1)
}
 0xd81   :  { %3459 = dma.vmem_to_hbm [thread:$0]  %s3454_s24, 512, %s4945_s9, [#allocation5], %s4340_s21, %s4340_s21, %s4341_s22  }
 0xd82   :  { %4336 = dma.done.wait [#allocation5], 512  }
 0xd83   :  { %4337 = vsyncadd [#allocation5], 4294966784 }
 0xd84   :  { %3463 = vsyncpa [#allocation4], 1 }
 0xd85   :  { %3464 = vsyncpa [#allocation7], 1 }
 0xd86   :  { %3465 = vsyncpa [#allocation10], 1 }
 0xd87   :  { %3466 = vsyncpa [#allocation13], 1 }
 0xd88   :  { %3467 = vsyncpa [#allocation16], 1 }
 0xd89   :  { %3468 = vsyncpa [#allocation5], 1 }

</bundles_post_ra>
